<compile_context>
chip_gen: v7x
topology: tpu7x:2x2x1
jax: 0.10.0
libtpu: 0.0.40
codegen_flags: <defaults>
</compile_context>

<pallas_src>
import functools
import numpy as np

import jax
import jax.numpy as jnp
from jax.experimental import pallas as pl
from jax.experimental.pallas import tpu as pltpu


# MXU operand dtype (accumulation is always f32 via preferred_element_type).
# bf16 runs the MXU at full rate on v6e/v7x and halves operand vreg/VMEM traffic;
# set to jnp.float32 for bit-faithful f32 math.
MATMUL_DTYPE = jnp.bfloat16


def _mxu_dot(a, b):
    return jnp.dot(a.astype(MATMUL_DTYPE), b.astype(MATMUL_DTYPE),
                   preferred_element_type=jnp.float32)


# ----------------------------------------------------------------------------
# Pallas kernel: full TransformerEncoder (all layers fused, post-norm, ReLU FFN,
# eval mode / dropout = 0), whole (B, S, D) batch resident in VMEM.
# ----------------------------------------------------------------------------
def _encoder_kernel(x_ref, mask_ref,
                    wqkv_ref, bqkv_ref, wo_ref, bo_ref,
                    ln1_g_ref, ln1_b_ref,
                    w1_ref, b1_ref, w2_ref, b2_ref,
                    ln2_g_ref, ln2_b_ref,
                    o_ref, *, num_heads, num_layers):
    B, S, D = x_ref.shape
    dh = D // num_heads
    scale = 1.0 / np.sqrt(dh)

    # Additive key-padding bias computed in-kernel (0 valid / -1e9 pad).
    bias = jnp.where(mask_ref[...] > 0, 0.0, -1e9).astype(jnp.float32)   # (B, S)
    bias = bias[:, None, :]                                              # (B, 1, S)

    # Flatten the batch so every projection / FFN matmul is one big MXU matmul.
    x = x_ref[...].reshape(B * S, D)                                     # (B*S, D)

    for l in range(num_layers):            # static unroll over fused layers
        # ---- multi-head self attention -----------------------------------
        qkv = _mxu_dot(x, wqkv_ref[l]) + bqkv_ref[l]                     # (B*S, 3D)
        q, k, v = qkv[:, :D], qkv[:, D:2 * D], qkv[:, 2 * D:]
        wo = wo_ref[l]                                                   # (D, D)

        attn = jnp.zeros((B * S, D), jnp.float32)
        for h in range(num_heads):         # static; each head is batched over B
            sl = slice(h * dh, (h + 1) * dh)
            qh = q[:, sl].reshape(B, S, dh)
            kh = k[:, sl].reshape(B, S, dh)
            vh = v[:, sl].reshape(B, S, dh)
            s = jnp.einsum('bqd,bkd->bqk',
                           qh.astype(MATMUL_DTYPE), kh.astype(MATMUL_DTYPE),
                           preferred_element_type=jnp.float32) * scale + bias
            m = jnp.max(s, axis=-1, keepdims=True)
            p = jnp.exp(s - m)
            p = p * pl.reciprocal(jnp.sum(p, axis=-1, keepdims=True), approx=True)
            oh = jnp.einsum('bqk,bkd->bqd',
                            p.astype(MATMUL_DTYPE), vh.astype(MATMUL_DTYPE),
                            preferred_element_type=jnp.float32)          # (B, S, dh)
            # Head concatenate eliminated: accumulate through the matching
            # rows of the out-projection weight instead.
            attn = attn + _mxu_dot(oh.reshape(B * S, dh), wo[sl, :])
        attn = attn + bo_ref[l]

        # ---- residual + LayerNorm 1 (f32 elementwise) ---------------------
        y = x + attn
        mu = jnp.mean(y, axis=-1, keepdims=True)
        var = jnp.mean((y - mu) ** 2, axis=-1, keepdims=True)
        y = (y - mu) * jax.lax.rsqrt(var + 1e-5) * ln1_g_ref[l] + ln1_b_ref[l]

        # ---- FFN (relu) + residual + LayerNorm 2 --------------------------
        h1 = jnp.maximum(_mxu_dot(y, w1_ref[l]) + b1_ref[l], 0.0)
        h2 = _mxu_dot(h1, w2_ref[l]) + b2_ref[l]
        z = y + h2
        mu2 = jnp.mean(z, axis=-1, keepdims=True)
        var2 = jnp.mean((z - mu2) ** 2, axis=-1, keepdims=True)
        x = (z - mu2) * jax.lax.rsqrt(var2 + 1e-5) * ln2_g_ref[l] + ln2_b_ref[l]

    o_ref[...] = x.reshape(B, S, D)


def encoder_forward_pallas(x, mask, layers, num_heads):
    """Fused encoder: all layers, whole batch, single gridless pallas_call."""
    B, S, D = x.shape
    stack = lambda name: jnp.stack([p[name] for p in layers], axis=0)
    kern = functools.partial(_encoder_kernel, num_heads=num_heads,
                             num_layers=len(layers))
    return pl.pallas_call(
        kern,
        out_shape=jax.ShapeDtypeStruct((B, S, D), jnp.float32),
        compiler_params=pltpu.CompilerParams(vmem_limit_bytes=32 * 1024 * 1024),
    )(x, mask.astype(jnp.int32),
      stack('wqkv'), stack('bqkv'), stack('wo'), stack('bo'),
      stack('ln1_g'), stack('ln1_b'),
      stack('w1'), stack('b1'), stack('w2'), stack('b2'),
      stack('ln2_g'), stack('ln2_b'))


# ----------------------------------------------------------------------------
# Pure-JAX reference encoder (f32 everywhere) for a correctness check
# ----------------------------------------------------------------------------
def encoder_layer_ref(x, mask, p, num_heads):
    B, S, D = x.shape
    dh = D // num_heads
    bias = jnp.where(mask, 0.0, -1e9)[:, None, None, :]
    qkv = x @ p['wqkv'] + p['bqkv'][0]
    q, k, v = qkv[..., :D], qkv[..., D:2 * D], qkv[..., 2 * D:]
    split = lambda t: t.reshape(B, S, num_heads, dh).transpose(0, 2, 1, 3)
    q, k, v = split(q), split(k), split(v)
    s = jnp.einsum('bhqd,bhkd->bhqk', q, k) / np.sqrt(dh) + bias
    o = jnp.einsum('bhqk,bhkd->bhqd', jax.nn.softmax(s, axis=-1), v)
    o = o.transpose(0, 2, 1, 3).reshape(B, S, D) @ p['wo'] + p['bo'][0]
    y = x + o
    ln = lambda t, g, b: ((t - t.mean(-1, keepdims=True))
                          * jax.lax.rsqrt(t.var(-1, keepdims=True) + 1e-5) * g + b)
    y = ln(y, p['ln1_g'][0], p['ln1_b'][0])
    h = jax.nn.relu(y @ p['w1'] + p['b1'][0]) @ p['w2'] + p['b2'][0]
    return ln(y + h, p['ln2_g'][0], p['ln2_b'][0])


def encoder_forward_ref(x, mask, layers, num_heads):
    for p in layers:
        x = encoder_layer_ref(x, mask, p, num_heads)
    return x


# ----------------------------------------------------------------------------
# HART forward (semantics of HART.forward, use_flash=False, eval mode)
# ----------------------------------------------------------------------------
def add_cls_emb(x, mask):
    # torch: prepend zero CLS embedding, prepend True to mask (mask_id == 1)
    B, _, D = x.shape
    x = jnp.concatenate([jnp.zeros((B, 1, D), x.dtype), x], axis=1)
    mask = jnp.concatenate([jnp.ones((B, 1), bool), mask], axis=1)
    return x, mask


def hart_forward(params, dis_embedding, rel_embedding, data,
                 K_hop, num_heads, encoder_fn):
    h_out_list = []
    subg_ent_emb = None
    for k in range(K_hop + 1):
        if k == 0:
            all_emb = jnp.concatenate([dis_embedding, rel_embedding], axis=0)
            dense = all_emb[data['xdis_id_dense']]
            pos = params['pos_table'][data['xdis_pos_dense']]
            dense, mask = add_cls_emb(dense, data['xdis_mask'])
        else:
            all_emb = jnp.concatenate([subg_ent_emb, rel_embedding], axis=0)
            dense = all_emb[data['xid_dense']]
            pos = params['pos_table'][data['x_pos_dense']]
            dense, mask = add_cls_emb(dense, data['xid_mask'])
        dense = dense + pos                               # position_mode is not None
        out = encoder_fn(dense, mask, params['layers'], num_heads)
        subg_hedge_emb = out[:, 0, :]                     # trans_result[0] (CLS row)
        h_out_list.append(subg_hedge_emb[data['source_hedge_idx']])
        if k < K_hop:
            # E2V pass: hid_dense already carries the prepended CLS column (id nE+1)
            ext = jnp.concatenate(
                [subg_hedge_emb, params['pad_edge_emb'], params['cls_edge_emb']], axis=0)
            dense_h = ext[data['hid_dense']]
            out_h = encoder_fn(dense_h, data['h_mask'], params['layers'], num_heads)
            subg_ent_emb = out_h[:, 0, :]
    h_out = h_out_list[-1]
    pos_ent_emb = subg_ent_emb[data['pos_subg_id']]
    neg_ent_emb = subg_ent_emb[data['neg_subg_id']]
    return h_out, pos_ent_emb, neg_ent_emb


# ----------------------------------------------------------------------------
# Deterministic parameter / data construction
# ----------------------------------------------------------------------------
def glorot(key, shape):
    lim = np.sqrt(6.0 / (shape[0] + shape[1]))
    return jax.random.uniform(key, shape, jnp.float32, -lim, lim)


def make_params(key, D, hidden, max_arity, trans_layer):
    ks = jax.random.split(key, 8 + 4 * trans_layer)
    params = {
        'cls_edge_emb': glorot(ks[0], (1, D)),
        'pad_edge_emb': glorot(ks[1], (1, D)),
        'pos_table': jax.random.normal(ks[2], (2 * max_arity + 3, D), jnp.float32),
        # lin_rel exists in __init__ but is unused in forward -> omitted.
        'layers': [],
    }
    for l in range(trans_layer):
        lk = jax.random.split(ks[3 + l], 4)
        params['layers'].append({
            'wqkv': glorot(lk[0], (D, 3 * D)),
            'bqkv': jnp.zeros((1, 3 * D), jnp.float32),
            'wo': glorot(lk[1], (D, D)),
            'bo': jnp.zeros((1, D), jnp.float32),
            'ln1_g': jnp.ones((1, D), jnp.float32),
            'ln1_b': jnp.zeros((1, D), jnp.float32),
            'w1': glorot(lk[2], (D, hidden)),
            'b1': jnp.zeros((1, hidden), jnp.float32),
            'w2': glorot(lk[3], (hidden, D)),
            'b2': jnp.zeros((1, D), jnp.float32),
            'ln2_g': jnp.ones((1, D), jnp.float32),
            'ln2_b': jnp.zeros((1, D), jnp.float32),
        })
    return params


def make_dense_graph_data(key, nE, nV, Lx, Lh, num_dis, num_rel, max_arity):
    """Synthetic stand-in for HART.format_matrix outputs (host-side preprocessing)."""
    ks = jax.random.split(key, 8)
    rng = np.random.default_rng(0)

    xdis_len = rng.integers(2, Lx + 1, size=nE)
    xid_len = rng.integers(2, Lx + 1, size=nE)
    h_len = rng.integers(2, Lh + 1, size=nV)

    xdis_mask = np.arange(Lx)[None, :] < xdis_len[:, None]
    xid_mask = np.arange(Lx)[None, :] < xid_len[:, None]
    h_mask = np.arange(Lh)[None, :] < h_len[:, None]

    xdis_id = np.asarray(jax.random.randint(ks[0], (nE, Lx), 0, num_dis + num_rel))
    xid = np.asarray(jax.random.randint(ks[1], (nE, Lx), 0, nV + num_rel))
    pos_fill = 2 * max_arity + 1
    xdis_pos = np.asarray(jax.random.randint(ks[2], (nE, Lx), 0, 2 * max_arity + 1))
    x_pos = np.asarray(jax.random.randint(ks[3], (nE, Lx), 0, 2 * max_arity + 1))
    xdis_pos = np.where(xdis_mask, xdis_pos, pos_fill)
    x_pos = np.where(xid_mask, x_pos, pos_fill)
    # add_cls_id on position rows: CLS position id = pos_fill + 1
    xdis_pos = np.concatenate([np.full((nE, 1), pos_fill + 1), xdis_pos], axis=1)
    x_pos = np.concatenate([np.full((nE, 1), pos_fill + 1), x_pos], axis=1)

    hid = np.asarray(jax.random.randint(ks[4], (nV, Lh), 0, nE))
    hid = np.where(h_mask, hid, nE)                         # fill value = nE (pad row)
    hid = np.concatenate([np.full((nV, 1), nE + 1), hid], axis=1)   # add_cls_id -> nE+1
    h_mask = np.concatenate([np.ones((nV, 1), bool), h_mask], axis=1)

    return {
        'xdis_id_dense': jnp.asarray(xdis_id, jnp.int32),
        'xdis_mask': jnp.asarray(xdis_mask),
        'xdis_pos_dense': jnp.asarray(xdis_pos, jnp.int32),
        'xid_dense': jnp.asarray(xid, jnp.int32),
        'xid_mask': jnp.asarray(xid_mask),
        'x_pos_dense': jnp.asarray(x_pos, jnp.int32),
        'hid_dense': jnp.asarray(hid, jnp.int32),
        'h_mask': jnp.asarray(h_mask),
        'source_hedge_idx': jnp.asarray([0, 2], jnp.int32),   # source_hedge_mark rows
        'pos_subg_id': jnp.asarray([1, 3], jnp.int32),
        'neg_subg_id': jnp.asarray([0, 4], jnp.int32),
    }


if __name__ == "__main__":
    # Hyperparameters (Namespace param) -- small, TPU-friendly
    D, num_heads, hidden = 32, 2, 64
    K_hop, max_arity, trans_layer = 1, 4, 1
    nE, nV, Lx, Lh = 4, 6, 7, 7          # seq length with CLS = 8
    num_dis, num_rel = 2 * K_hop + 3, 3

    key = jax.random.PRNGKey(0)
    k_par, k_dat, k_dis, k_rel = jax.random.split(key, 4)

    params = make_params(k_par, D, hidden, max_arity, trans_layer)
    data = make_dense_graph_data(k_dat, nE, nV, Lx, Lh, num_dis, num_rel, max_arity)
    dis_embedding = jax.random.normal(k_dis, (num_dis, D), jnp.float32)
    rel_embedding = jax.random.normal(k_rel, (num_rel, D), jnp.float32)

    # Pallas-kernel forward (fused encoder, bf16 MXU operands, f32 accumulation)
    h_out, pos_emb, neg_emb = hart_forward(
        params, dis_embedding, rel_embedding, data,
        K_hop, num_heads, encoder_forward_pallas)
    jax.block_until_ready((h_out, pos_emb, neg_emb))

    # Pure-JAX f32 reference forward (same math, no Pallas) for a sanity check.
    # Tolerance is loosened when the kernel uses bf16 MXU operands.
    h_ref, p_ref, n_ref = hart_forward(
        params, dis_embedding, rel_embedding, data,
        K_hop, num_heads, encoder_forward_ref)
    tol = 2e-3 if MATMUL_DTYPE == jnp.float32 else 3e-2
    np.testing.assert_allclose(np.asarray(h_out), np.asarray(h_ref), rtol=tol, atol=tol)
    np.testing.assert_allclose(np.asarray(pos_emb), np.asarray(p_ref), rtol=tol, atol=tol)
    np.testing.assert_allclose(np.asarray(neg_emb), np.asarray(n_ref), rtol=tol, atol=tol)

    assert h_out.shape == (2, D) and pos_emb.shape == (2, D) and neg_emb.shape == (2, D)
    print("KERNEL_OK")
</pallas_src>

<mosaic_0001>
module attributes {stable_mosaic.version = 11 : i64} {
  func.func @_encoder_kernel(%arg0: memref<4x8x32xf32, #tpu.memory_space<vmem>>, %arg1: memref<4x8xi32, #tpu.memory_space<vmem>>, %arg2: memref<1x32x96xf32, #tpu.memory_space<vmem>>, %arg3: memref<1x1x96xf32, #tpu.memory_space<vmem>>, %arg4: memref<1x32x32xf32, #tpu.memory_space<vmem>>, %arg5: memref<1x1x32xf32, #tpu.memory_space<vmem>>, %arg6: memref<1x1x32xf32, #tpu.memory_space<vmem>>, %arg7: memref<1x1x32xf32, #tpu.memory_space<vmem>>, %arg8: memref<1x32x64xf32, #tpu.memory_space<vmem>>, %arg9: memref<1x1x64xf32, #tpu.memory_space<vmem>>, %arg10: memref<1x64x32xf32, #tpu.memory_space<vmem>>, %arg11: memref<1x1x32xf32, #tpu.memory_space<vmem>>, %arg12: memref<1x1x32xf32, #tpu.memory_space<vmem>>, %arg13: memref<1x1x32xf32, #tpu.memory_space<vmem>>, %arg14: memref<4x8x32xf32, #tpu.memory_space<vmem>>) attributes {dimension_semantics = [], scalar_prefetch = 0 : i64, scratch_operands = 0 : i64, tpu.core_type = #tpu.core_type<tc>} {
    %c0 = arith.constant 0 : index
    %c0_0 = arith.constant 0 : index
    %0 = vector.load %arg1[%c0, %c0_0] : memref<4x8xi32, #tpu.memory_space<vmem>>, vector<4x8xi32>
    %c0_i32 = arith.constant 0 : i32
    %1 = vector.broadcast %c0_i32 : i32 to vector<4x8xi32>
    %2 = arith.cmpi sgt, %0, %1 : vector<4x8xi32>
    %cst = arith.constant 0.000000e+00 : f32
    %cst_1 = arith.constant -1.000000e+09 : f32
    %3 = vector.broadcast %cst : f32 to vector<4x8xf32>
    %4 = vector.broadcast %cst_1 : f32 to vector<4x8xf32>
    %5 = arith.select %2, %3, %4 : vector<4x8xi1>, vector<4x8xf32>
    %6 = vector.shape_cast %5 : vector<4x8xf32> to vector<4x1x8xf32>
    %c0_2 = arith.constant 0 : index
    %c0_3 = arith.constant 0 : index
    %c0_4 = arith.constant 0 : index
    %7 = vector.load %arg0[%c0_2, %c0_3, %c0_4] : memref<4x8x32xf32, #tpu.memory_space<vmem>>, vector<4x8x32xf32>
    %8 = vector.shape_cast %7 : vector<4x8x32xf32> to vector<32x32xf32>
    %c0_5 = arith.constant 0 : index
    %c0_6 = arith.constant 0 : index
    %c0_7 = arith.constant 0 : index
    %9 = vector.load %arg2[%c0_5, %c0_6, %c0_7] : memref<1x32x96xf32, #tpu.memory_space<vmem>>, vector<1x32x96xf32>
    %10 = vector.shape_cast %9 : vector<1x32x96xf32> to vector<32x96xf32>
    %11 = arith.truncf %8 : vector<32x32xf32> to vector<32x32xbf16>
    %12 = arith.truncf %10 : vector<32x96xf32> to vector<32x96xbf16>
    %cst_8 = arith.constant dense<0.000000e+00> : vector<32x96xf32>
    %13 = tpu.matmul %11, %12, %cst_8 {dimension_numbers = #tpu.dot_dimension_numbers<[1], [0], [0], [1], [0, 0, 1, 1], [], []>} : vector<32x32xbf16>, vector<32x96xbf16>, vector<32x96xf32> -> vector<32x96xf32>
    %c0_9 = arith.constant 0 : index
    %c0_10 = arith.constant 0 : index
    %c0_11 = arith.constant 0 : index
    %14 = vector.load %arg3[%c0_9, %c0_10, %c0_11] : memref<1x1x96xf32, #tpu.memory_space<vmem>>, vector<1x1x96xf32>
    %15 = vector.shape_cast %14 : vector<1x1x96xf32> to vector<1x96xf32>
    %16 = vector.broadcast %15 : vector<1x96xf32> to vector<32x96xf32>
    %17 = arith.addf %13, %16 : vector<32x96xf32>
    %18 = vector.extract_strided_slice %17 {offsets = [0, 0], sizes = [32, 32], strides = [1, 1]} : vector<32x96xf32> to vector<32x32xf32>
    %19 = vector.extract_strided_slice %17 {offsets = [0, 32], sizes = [32, 32], strides = [1, 1]} : vector<32x96xf32> to vector<32x32xf32>
    %20 = vector.extract_strided_slice %17 {offsets = [0, 64], sizes = [32, 32], strides = [1, 1]} : vector<32x96xf32> to vector<32x32xf32>
    %c0_12 = arith.constant 0 : index
    %c0_13 = arith.constant 0 : index
    %c0_14 = arith.constant 0 : index
    %21 = vector.load %arg4[%c0_12, %c0_13, %c0_14] : memref<1x32x32xf32, #tpu.memory_space<vmem>>, vector<1x32x32xf32>
    %22 = vector.shape_cast %21 : vector<1x32x32xf32> to vector<32x32xf32>
    %cst_15 = arith.constant 0.000000e+00 : f32
    %23 = vector.broadcast %cst_15 : f32 to vector<32x32xf32>
    %24 = vector.extract_strided_slice %18 {offsets = [0, 0], sizes = [32, 16], strides = [1, 1]} : vector<32x32xf32> to vector<32x16xf32>
    %25 = vector.shape_cast %24 : vector<32x16xf32> to vector<4x8x16xf32>
    %26 = vector.extract_strided_slice %19 {offsets = [0, 0], sizes = [32, 16], strides = [1, 1]} : vector<32x32xf32> to vector<32x16xf32>
    %27 = vector.shape_cast %26 : vector<32x16xf32> to vector<4x8x16xf32>
    %28 = vector.extract_strided_slice %20 {offsets = [0, 0], sizes = [32, 16], strides = [1, 1]} : vector<32x32xf32> to vector<32x16xf32>
    %29 = vector.shape_cast %28 : vector<32x16xf32> to vector<4x8x16xf32>
    %30 = arith.truncf %25 : vector<4x8x16xf32> to vector<4x8x16xbf16>
    %31 = arith.truncf %27 : vector<4x8x16xf32> to vector<4x8x16xbf16>
    "tpu.trace_start"() <{level = 10 : i32, message = "bqd,bkd->bqk"}> : () -> ()
    %cst_16 = arith.constant dense<0.000000e+00> : vector<4x8x8xf32>
    %32 = tpu.matmul %30, %31, %cst_16 {dimension_numbers = #tpu.dot_dimension_numbers<[2], [2], [1], [1], [0, 0, 0, 1, 1, 1], [0], [0]>} : vector<4x8x16xbf16>, vector<4x8x16xbf16>, vector<4x8x8xf32> -> vector<4x8x8xf32>
    "tpu.trace_stop"() : () -> ()
    %cst_17 = arith.constant 2.500000e-01 : f32
    %33 = vector.broadcast %cst_17 : f32 to vector<4x8x8xf32>
    %34 = arith.mulf %32, %33 : vector<4x8x8xf32>
    %35 = vector.broadcast %6 : vector<4x1x8xf32> to vector<4x8x8xf32>
    %36 = arith.addf %34, %35 : vector<4x8x8xf32>
    %cst_18 = arith.constant dense<0xFF800000> : vector<4x8xf32>
    %37 = vector.multi_reduction <maximumf>, %36, %cst_18 [2] : vector<4x8x8xf32> to vector<4x8xf32>
    %38 = vector.shape_cast %37 : vector<4x8xf32> to vector<4x8x1xf32>
    %39 = vector.broadcast %38 : vector<4x8x1xf32> to vector<4x8x8xf32>
    %40 = arith.subf %36, %39 : vector<4x8x8xf32>
    %41 = math.exp %40 : vector<4x8x8xf32>
    %cst_19 = arith.constant dense<0.000000e+00> : vector<4x8xf32>
    %42 = vector.multi_reduction <add>, %41, %cst_19 [2] : vector<4x8x8xf32> to vector<4x8xf32>
    %43 = vector.shape_cast %42 : vector<4x8xf32> to vector<4x8x1xf32>
    %44 = tpu.reciprocal %43 {approx = true} : vector<4x8x1xf32> -> vector<4x8x1xf32>
    %45 = vector.broadcast %44 : vector<4x8x1xf32> to vector<4x8x8xf32>
    %46 = arith.mulf %41, %45 : vector<4x8x8xf32>
    %47 = arith.truncf %46 : vector<4x8x8xf32> to vector<4x8x8xbf16>
    %48 = arith.truncf %29 : vector<4x8x16xf32> to vector<4x8x16xbf16>
    "tpu.trace_start"() <{level = 10 : i32, message = "bqk,bkd->bqd"}> : () -> ()
    %cst_20 = arith.constant dense<0.000000e+00> : vector<4x8x16xf32>
    %49 = tpu.matmul %47, %48, %cst_20 {dimension_numbers = #tpu.dot_dimension_numbers<[2], [1], [1], [2], [0, 0, 0, 1, 1, 2], [0], [0]>} : vector<4x8x8xbf16>, vector<4x8x16xbf16>, vector<4x8x16xf32> -> vector<4x8x16xf32>
    "tpu.trace_stop"() : () -> ()
    %50 = vector.shape_cast %49 : vector<4x8x16xf32> to vector<32x16xf32>
    %51 = vector.extract_strided_slice %22 {offsets = [0, 0], sizes = [16, 32], strides = [1, 1]} : vector<32x32xf32> to vector<16x32xf32>
    %52 = arith.truncf %50 : vector<32x16xf32> to vector<32x16xbf16>
    %53 = arith.truncf %51 : vector<16x32xf32> to vector<16x32xbf16>
    %cst_21 = arith.constant dense<0.000000e+00> : vector<32x32xf32>
    %54 = tpu.matmul %52, %53, %cst_21 {dimension_numbers = #tpu.dot_dimension_numbers<[1], [0], [0], [1], [0, 0, 1, 1], [], []>} : vector<32x16xbf16>, vector<16x32xbf16>, vector<32x32xf32> -> vector<32x32xf32>
    %55 = arith.addf %23, %54 : vector<32x32xf32>
    %56 = vector.extract_strided_slice %18 {offsets = [0, 16], sizes = [32, 16], strides = [1, 1]} : vector<32x32xf32> to vector<32x16xf32>
    %57 = vector.shape_cast %56 : vector<32x16xf32> to vector<4x8x16xf32>
    %58 = vector.extract_strided_slice %19 {offsets = [0, 16], sizes = [32, 16], strides = [1, 1]} : vector<32x32xf32> to vector<32x16xf32>
    %59 = vector.shape_cast %58 : vector<32x16xf32> to vector<4x8x16xf32>
    %60 = vector.extract_strided_slice %20 {offsets = [0, 16], sizes = [32, 16], strides = [1, 1]} : vector<32x32xf32> to vector<32x16xf32>
    %61 = vector.shape_cast %60 : vector<32x16xf32> to vector<4x8x16xf32>
    %62 = arith.truncf %57 : vector<4x8x16xf32> to vector<4x8x16xbf16>
    %63 = arith.truncf %59 : vector<4x8x16xf32> to vector<4x8x16xbf16>
    "tpu.trace_start"() <{level = 10 : i32, message = "bqd,bkd->bqk"}> : () -> ()
    %cst_22 = arith.constant dense<0.000000e+00> : vector<4x8x8xf32>
    %64 = tpu.matmul %62, %63, %cst_22 {dimension_numbers = #tpu.dot_dimension_numbers<[2], [2], [1], [1], [0, 0, 0, 1, 1, 1], [0], [0]>} : vector<4x8x16xbf16>, vector<4x8x16xbf16>, vector<4x8x8xf32> -> vector<4x8x8xf32>
    "tpu.trace_stop"() : () -> ()
    %cst_23 = arith.constant 2.500000e-01 : f32
    %65 = vector.broadcast %cst_23 : f32 to vector<4x8x8xf32>
    %66 = arith.mulf %64, %65 : vector<4x8x8xf32>
    %67 = vector.broadcast %6 : vector<4x1x8xf32> to vector<4x8x8xf32>
    %68 = arith.addf %66, %67 : vector<4x8x8xf32>
    %cst_24 = arith.constant dense<0xFF800000> : vector<4x8xf32>
    %69 = vector.multi_reduction <maximumf>, %68, %cst_24 [2] : vector<4x8x8xf32> to vector<4x8xf32>
    %70 = vector.shape_cast %69 : vector<4x8xf32> to vector<4x8x1xf32>
    %71 = vector.broadcast %70 : vector<4x8x1xf32> to vector<4x8x8xf32>
    %72 = arith.subf %68, %71 : vector<4x8x8xf32>
    %73 = math.exp %72 : vector<4x8x8xf32>
    %cst_25 = arith.constant dense<0.000000e+00> : vector<4x8xf32>
    %74 = vector.multi_reduction <add>, %73, %cst_25 [2] : vector<4x8x8xf32> to vector<4x8xf32>
    %75 = vector.shape_cast %74 : vector<4x8xf32> to vector<4x8x1xf32>
    %76 = tpu.reciprocal %75 {approx = true} : vector<4x8x1xf32> -> vector<4x8x1xf32>
    %77 = vector.broadcast %76 : vector<4x8x1xf32> to vector<4x8x8xf32>
    %78 = arith.mulf %73, %77 : vector<4x8x8xf32>
    %79 = arith.truncf %78 : vector<4x8x8xf32> to vector<4x8x8xbf16>
    %80 = arith.truncf %61 : vector<4x8x16xf32> to vector<4x8x16xbf16>
    "tpu.trace_start"() <{level = 10 : i32, message = "bqk,bkd->bqd"}> : () -> ()
    %cst_26 = arith.constant dense<0.000000e+00> : vector<4x8x16xf32>
    %81 = tpu.matmul %79, %80, %cst_26 {dimension_numbers = #tpu.dot_dimension_numbers<[2], [1], [1], [2], [0, 0, 0, 1, 1, 2], [0], [0]>} : vector<4x8x8xbf16>, vector<4x8x16xbf16>, vector<4x8x16xf32> -> vector<4x8x16xf32>
    "tpu.trace_stop"() : () -> ()
    %82 = vector.shape_cast %81 : vector<4x8x16xf32> to vector<32x16xf32>
    %83 = vector.extract_strided_slice %22 {offsets = [16, 0], sizes = [16, 32], strides = [1, 1]} : vector<32x32xf32> to vector<16x32xf32>
    %84 = arith.truncf %82 : vector<32x16xf32> to vector<32x16xbf16>
    %85 = arith.truncf %83 : vector<16x32xf32> to vector<16x32xbf16>
    %cst_27 = arith.constant dense<0.000000e+00> : vector<32x32xf32>
    %86 = tpu.matmul %84, %85, %cst_27 {dimension_numbers = #tpu.dot_dimension_numbers<[1], [0], [0], [1], [0, 0, 1, 1], [], []>} : vector<32x16xbf16>, vector<16x32xbf16>, vector<32x32xf32> -> vector<32x32xf32>
    %87 = arith.addf %55, %86 : vector<32x32xf32>
    %c0_28 = arith.constant 0 : index
    %c0_29 = arith.constant 0 : index
    %c0_30 = arith.constant 0 : index
    %88 = vector.load %arg5[%c0_28, %c0_29, %c0_30] : memref<1x1x32xf32, #tpu.memory_space<vmem>>, vector<1x1x32xf32>
    %89 = vector.shape_cast %88 : vector<1x1x32xf32> to vector<1x32xf32>
    %90 = vector.broadcast %89 : vector<1x32xf32> to vector<32x32xf32>
    %91 = arith.addf %87, %90 : vector<32x32xf32>
    %92 = arith.addf %8, %91 : vector<32x32xf32>
    %cst_31 = arith.constant dense<0.000000e+00> : vector<32xf32>
    %93 = vector.multi_reduction <add>, %92, %cst_31 [1] : vector<32x32xf32> to vector<32xf32>
    %94 = vector.shape_cast %93 : vector<32xf32> to vector<32x1xf32>
    %cst_32 = arith.constant 3.200000e+01 : f32
    %95 = vector.broadcast %cst_32 : f32 to vector<32x1xf32>
    %96 = arith.divf %94, %95 : vector<32x1xf32>
    %97 = vector.broadcast %96 : vector<32x1xf32> to vector<32x32xf32>
    %98 = arith.subf %92, %97 : vector<32x32xf32>
    %99 = arith.mulf %98, %98 : vector<32x32xf32>
    %cst_33 = arith.constant dense<0.000000e+00> : vector<32xf32>
    %100 = vector.multi_reduction <add>, %99, %cst_33 [1] : vector<32x32xf32> to vector<32xf32>
    %101 = vector.shape_cast %100 : vector<32xf32> to vector<32x1xf32>
    %cst_34 = arith.constant 3.200000e+01 : f32
    %102 = vector.broadcast %cst_34 : f32 to vector<32x1xf32>
    %103 = arith.divf %101, %102 : vector<32x1xf32>
    %104 = vector.broadcast %96 : vector<32x1xf32> to vector<32x32xf32>
    %105 = arith.subf %92, %104 : vector<32x32xf32>
    %cst_35 = arith.constant 9.99999974E-6 : f32
    %106 = vector.broadcast %cst_35 : f32 to vector<32x1xf32>
    %107 = arith.addf %103, %106 : vector<32x1xf32>
    %108 = math.rsqrt %107 : vector<32x1xf32>
    %109 = vector.broadcast %108 : vector<32x1xf32> to vector<32x32xf32>
    %110 = arith.mulf %105, %109 : vector<32x32xf32>
    %c0_36 = arith.constant 0 : index
    %c0_37 = arith.constant 0 : index
    %c0_38 = arith.constant 0 : index
    %111 = vector.load %arg6[%c0_36, %c0_37, %c0_38] : memref<1x1x32xf32, #tpu.memory_space<vmem>>, vector<1x1x32xf32>
    %112 = vector.shape_cast %111 : vector<1x1x32xf32> to vector<1x32xf32>
    %113 = vector.broadcast %112 : vector<1x32xf32> to vector<32x32xf32>
    %114 = arith.mulf %110, %113 : vector<32x32xf32>
    %c0_39 = arith.constant 0 : index
    %c0_40 = arith.constant 0 : index
    %c0_41 = arith.constant 0 : index
    %115 = vector.load %arg7[%c0_39, %c0_40, %c0_41] : memref<1x1x32xf32, #tpu.memory_space<vmem>>, vector<1x1x32xf32>
    %116 = vector.shape_cast %115 : vector<1x1x32xf32> to vector<1x32xf32>
    %117 = vector.broadcast %116 : vector<1x32xf32> to vector<32x32xf32>
    %118 = arith.addf %114, %117 : vector<32x32xf32>
    %c0_42 = arith.constant 0 : index
    %c0_43 = arith.constant 0 : index
    %c0_44 = arith.constant 0 : index
    %119 = vector.load %arg8[%c0_42, %c0_43, %c0_44] : memref<1x32x64xf32, #tpu.memory_space<vmem>>, vector<1x32x64xf32>
    %120 = vector.shape_cast %119 : vector<1x32x64xf32> to vector<32x64xf32>
    %121 = arith.truncf %118 : vector<32x32xf32> to vector<32x32xbf16>
    %122 = arith.truncf %120 : vector<32x64xf32> to vector<32x64xbf16>
    %cst_45 = arith.constant dense<0.000000e+00> : vector<32x64xf32>
    %123 = tpu.matmul %121, %122, %cst_45 {dimension_numbers = #tpu.dot_dimension_numbers<[1], [0], [0], [1], [0, 0, 1, 1], [], []>} : vector<32x32xbf16>, vector<32x64xbf16>, vector<32x64xf32> -> vector<32x64xf32>
    %c0_46 = arith.constant 0 : index
    %c0_47 = arith.constant 0 : index
    %c0_48 = arith.constant 0 : index
    %124 = vector.load %arg9[%c0_46, %c0_47, %c0_48] : memref<1x1x64xf32, #tpu.memory_space<vmem>>, vector<1x1x64xf32>
    %125 = vector.shape_cast %124 : vector<1x1x64xf32> to vector<1x64xf32>
    %126 = vector.broadcast %125 : vector<1x64xf32> to vector<32x64xf32>
    %127 = arith.addf %123, %126 : vector<32x64xf32>
    %cst_49 = arith.constant 0.000000e+00 : f32
    %128 = vector.broadcast %cst_49 : f32 to vector<32x64xf32>
    %129 = arith.maximumf %127, %128 : vector<32x64xf32>
    %c0_50 = arith.constant 0 : index
    %c0_51 = arith.constant 0 : index
    %c0_52 = arith.constant 0 : index
    %130 = vector.load %arg10[%c0_50, %c0_51, %c0_52] : memref<1x64x32xf32, #tpu.memory_space<vmem>>, vector<1x64x32xf32>
    %131 = vector.shape_cast %130 : vector<1x64x32xf32> to vector<64x32xf32>
    %132 = arith.truncf %129 : vector<32x64xf32> to vector<32x64xbf16>
    %133 = arith.truncf %131 : vector<64x32xf32> to vector<64x32xbf16>
    %cst_53 = arith.constant dense<0.000000e+00> : vector<32x32xf32>
    %134 = tpu.matmul %132, %133, %cst_53 {dimension_numbers = #tpu.dot_dimension_numbers<[1], [0], [0], [1], [0, 0, 1, 1], [], []>} : vector<32x64xbf16>, vector<64x32xbf16>, vector<32x32xf32> -> vector<32x32xf32>
    %c0_54 = arith.constant 0 : index
    %c0_55 = arith.constant 0 : index
    %c0_56 = arith.constant 0 : index
    %135 = vector.load %arg11[%c0_54, %c0_55, %c0_56] : memref<1x1x32xf32, #tpu.memory_space<vmem>>, vector<1x1x32xf32>
    %136 = vector.shape_cast %135 : vector<1x1x32xf32> to vector<1x32xf32>
    %137 = vector.broadcast %136 : vector<1x32xf32> to vector<32x32xf32>
    %138 = arith.addf %134, %137 : vector<32x32xf32>
    %139 = arith.addf %118, %138 : vector<32x32xf32>
    %cst_57 = arith.constant dense<0.000000e+00> : vector<32xf32>
    %140 = vector.multi_reduction <add>, %139, %cst_57 [1] : vector<32x32xf32> to vector<32xf32>
    %141 = vector.shape_cast %140 : vector<32xf32> to vector<32x1xf32>
    %cst_58 = arith.constant 3.200000e+01 : f32
    %142 = vector.broadcast %cst_58 : f32 to vector<32x1xf32>
    %143 = arith.divf %141, %142 : vector<32x1xf32>
    %144 = vector.broadcast %143 : vector<32x1xf32> to vector<32x32xf32>
    %145 = arith.subf %139, %144 : vector<32x32xf32>
    %146 = arith.mulf %145, %145 : vector<32x32xf32>
    %cst_59 = arith.constant dense<0.000000e+00> : vector<32xf32>
    %147 = vector.multi_reduction <add>, %146, %cst_59 [1] : vector<32x32xf32> to vector<32xf32>
    %148 = vector.shape_cast %147 : vector<32xf32> to vector<32x1xf32>
    %cst_60 = arith.constant 3.200000e+01 : f32
    %149 = vector.broadcast %cst_60 : f32 to vector<32x1xf32>
    %150 = arith.divf %148, %149 : vector<32x1xf32>
    %151 = vector.broadcast %143 : vector<32x1xf32> to vector<32x32xf32>
    %152 = arith.subf %139, %151 : vector<32x32xf32>
    %cst_61 = arith.constant 9.99999974E-6 : f32
    %153 = vector.broadcast %cst_61 : f32 to vector<32x1xf32>
    %154 = arith.addf %150, %153 : vector<32x1xf32>
    %155 = math.rsqrt %154 : vector<32x1xf32>
    %156 = vector.broadcast %155 : vector<32x1xf32> to vector<32x32xf32>
    %157 = arith.mulf %152, %156 : vector<32x32xf32>
    %c0_62 = arith.constant 0 : index
    %c0_63 = arith.constant 0 : index
    %c0_64 = arith.constant 0 : index
    %158 = vector.load %arg12[%c0_62, %c0_63, %c0_64] : memref<1x1x32xf32, #tpu.memory_space<vmem>>, vector<1x1x32xf32>
    %159 = vector.shape_cast %158 : vector<1x1x32xf32> to vector<1x32xf32>
    %160 = vector.broadcast %159 : vector<1x32xf32> to vector<32x32xf32>
    %161 = arith.mulf %157, %160 : vector<32x32xf32>
    %c0_65 = arith.constant 0 : index
    %c0_66 = arith.constant 0 : index
    %c0_67 = arith.constant 0 : index
    %162 = vector.load %arg13[%c0_65, %c0_66, %c0_67] : memref<1x1x32xf32, #tpu.memory_space<vmem>>, vector<1x1x32xf32>
    %163 = vector.shape_cast %162 : vector<1x1x32xf32> to vector<1x32xf32>
    %164 = vector.broadcast %163 : vector<1x32xf32> to vector<32x32xf32>
    %165 = arith.addf %161, %164 : vector<32x32xf32>
    %166 = vector.shape_cast %165 : vector<32x32xf32> to vector<4x8x32xf32>
    %c0_68 = arith.constant 0 : index
    %c0_69 = arith.constant 0 : index
    %c0_70 = arith.constant 0 : index
    %167 = vector.load %arg14[%c0_68, %c0_69, %c0_70] : memref<4x8x32xf32, #tpu.memory_space<vmem>>, vector<4x8x32xf32>
    tpu.vector_store %arg14[%c0_68, %c0_69, %c0_70], %166 {strides = array<i32>} : memref<4x8x32xf32, #tpu.memory_space<vmem>>, vector<4x8x32xf32>,
    return
  }
}

</mosaic_0001>

<bundles_post_ra>
// kernel: tpu_custom_call.1
= control target key start
LH: loop header
LB: loop body
LE: loop exit
PB: predicated region body
PF: predicated region fallthrough
CT: control target
= control target key end

     0   :  { %19 = vsyncpa [#allocation3], 0  ;;  %s2350_s0 = inlined_call_operand.vmem [shape: f32[4,8,32], index: 0, kind: input, shape index: {}]   ;;  %s2351_s1 = inlined_call_operand.hbm [shape: s32[4,8], index: 1, kind: input, shape index: {}]   ;;  %s2352_s2 = inlined_call_operand.vmem [shape: f32[1,32,96], index: 2, kind: input, shape index: {}]   ;;  %s2353_s3 = inlined_call_operand.vmem [shape: f32[1,1,96], index: 3, kind: input, shape index: {}]   ;;  %s2354_s4 = inlined_call_operand.vmem [shape: f32[1,32,32], index: 4, kind: input, shape index: {}]   ;;  %s2355_s5 = inlined_call_operand.vmem [shape: f32[1,1,32], index: 5, kind: input, shape index: {}]   ;;  %s2356_s6 = inlined_call_operand.vmem [shape: f32[1,1,32], index: 6, kind: input, shape index: {}]   ;;  %s2357_s7 = inlined_call_operand.vmem [shape: f32[1,1,32], index: 7, kind: input, shape index: {}]   ;;  %s2358_s8 = inlined_call_operand.hbm [shape: f32[1,32,64], index: 8, kind: input, shape index: {}]   ;;  %s2359_s9 = inlined_call_operand.vmem [shape: f32[1,1,64], index: 9, kind: input, shape index: {}]   ;;  %s2360_s10 = inlined_call_operand.vmem [shape: f32[1,64,32], index: 10, kind: input, shape index: {}]   ;;  %s2361_s11 = inlined_call_operand.vmem [shape: f32[1,1,32], index: 11, kind: input, shape index: {}]   ;;  %s2362_s12 = inlined_call_operand.vmem [shape: f32[1,1,32], index: 12, kind: input, shape index: {}]   ;;  %s2363_s13 = inlined_call_operand.vmem [shape: f32[1,1,32], index: 13, kind: input, shape index: {}]   ;;  %s2364_s14 = inlined_call_operand.hbm [shape: f32[4,8,32], index: 14, kind: output, shape index: {}]  }
   0x1   :  { %20 = vsyncpa [#allocation6], 0 }
   0x2   :  { %21 = vsyncpa [#allocation4], 0  ;;  %s1918_s29 = smov [#allocation2]   ;;  %s1919_s15 = smov [#allocation5]  }
   0x3   :  { %s30_s30 = sshll.u32 %s1918_s29, 4  ;;  %s51_s16 = sshll.u32 %s1919_s15, 4  ;;  %s31_s30 = int_to_ptr.vmem [resolvable:$true] %s30_s30  ;;  %s2007_s16 = int_to_ptr.vmem [resolvable:$true] %s51_s16 }
   0x4   :  { %s1846_s19 = scalar_lea.hbm %s2351_s1, 64 }
   0x5   :  { %p1847_p0 = scmp.ne.s32.totalorder %s2351_s1, %s1846_s19  ;;  %p1850_p1 = scmp.lt.u32.totalorder %s1846_s19, %s2351_s1 }
   0x7   :  { %p1852_p2 = pnand %p1850_p1, %p1847_p0 }
   0x9   :  { %1855 = shalt.err (!%p1852_p2)
}
   0xa   :  { %s1856_s24 = scalar_lea.vmem %s31_s30, 64  ;;  %p1861_p4 = scmp.lt.s32.totalorder %s31_s30, %s31_s30 }
   0xb   :  { %p1857_p3 = scmp.ne.s32.totalorder %s31_s30, %s1856_s24  ;;  %p1862_p5 = scmp.lt.s32.totalorder %s1856_s24, %s1856_s24 }
   0xd   :  { %p1863_p6 = por %p1862_p5, %p1861_p4 }
   0xf   :  { %p1864_p7 = pnand %p1863_p6, %p1857_p3 }
  0x11   :  { %1867 = shalt.err (!%p1864_p7)
}
  0x12   :  { %33 = dma.hbm_to_vmem [thread:$0]  %s2351_s1, 64, %s31_s30, [#allocation3]  }
  0x13   :  { %s1868_s29 = scalar_lea.hbm %s2358_s8, 512 }
  0x14   :  { %p1869_p8 = scmp.ne.s32.totalorder %s2358_s8, %s1868_s29  ;;  %p1872_p9 = scmp.lt.u32.totalorder %s1868_s29, %s2358_s8 }
  0x16   :  { %p1874_p10 = pnand %p1872_p9, %p1869_p8 }
  0x18   :  { %1877 = shalt.err (!%p1874_p10)
}
  0x19   :  { %s1878_s20 = scalar_lea.vmem %s2007_s16, 512  ;;  %p1883_p12 = scmp.lt.s32.totalorder %s2007_s16, %s2007_s16 }
  0x1a   :  { %p1879_p11 = scmp.ne.s32.totalorder %s2007_s16, %s1878_s20  ;;  %p1884_p13 = scmp.lt.s32.totalorder %s1878_s20, %s1878_s20 }
  0x1c   :  { %p1885_p0 = por %p1884_p13, %p1883_p12 }
  0x1e   :  { %p1886_p1 = pnand %p1885_p0, %p1879_p11 }
  0x20   :  { %1889 = shalt.err (!%p1886_p1)
}
  0x21   :  { %s1920_s1 = smov 128   ;;  %s1921_s30 = smov 8  }
  0x22   :  { %57 = dma.hbm_to_vmem [thread:$0]  %s2358_s8, 512, %s2007_s16, [#allocation6], %s1920_s1, %s1920_s1, %s1921_s30  }
  0x23   :  { %1912 = dma.done.wait [#allocation3], 64  }
  0x24   :  { %1913 = vsyncadd [#allocation3], 4294967232 }
  0x25   :  { %1914 = dma.done.wait [#allocation6], 512  }
  0x26   :  { %1915 = vsyncadd [#allocation6], 4294966784  ;;  %v107_v0 = vld [vmem:[%s2352_s2] sm:$0xff]  ;;  %v108_v1 = vld [vmem:[%s2352_s2 + $0x8] sm:$0xff]  ;;  %vm122_vm0 = vcmask 261120   ;;  %v1922_v12 = vmov 0.0   ;;  %v82_v36 = vlaneseq }
  0x27   :  { %v109_v2 = vld [vmem:[%s2352_s2 + $0x10] sm:$0xff]  ;;  %v113_v3 = vpack.c.bf16 %v108_v1, %v107_v0  ;;  %v110_v4 = vld [vmem:[%s2352_s2 + $0x18] sm:$0xff]  ;;  %v2056_v5 = vld [vmem:[%s2350_s0] sm:$0xff]  ;;  %1658 = vmatprep.subr.bf16.mxu0 %v1922_v12  ;;  %vm1923_vm1 = vmmov 0   ;;  %vm189_vm2 = vcmask 130048   ;;  %vm411_vm4 = vcmask 64512  }
  0x28   :  { %v2061_v6 = vld [vmem:[%s2350_s0 + $0x8] sm:$0xff]  ;;  %v114_v7 = vpack.c.bf16 %v110_v4, %v109_v2  ;;  %v2069_v9 = vld [vmem:[%s2350_s0 + $0x10] sm:$0xff]  ;;  %v2074_v10 = vld [vmem:[%s2350_s0 + $0x18] sm:$0xff]  ;;  %1660 = vmatprep.mubr.msk.bf16.mxu0 %vm1923_vm1, %v1922_v12  ;;  %s1924_s0 = smov 96   ;;  %v1925_v34 = vmov 1966171168  }
  0x29   :  { %v111_v8 = vpack.c.bf16 %v2061_v6, %v2056_v5  ;;  %1644 = vmatprep.subr.bf16.mxu1 %v113_v3  ;;  %v112_v11 = vpack.c.bf16 %v2074_v10, %v2069_v9  ;;  %v1558_v13 = vld [vmem:[%s2353_s3] ss:$0 sm:$0xff]  ;;  %v80_v35 = vunpack.c.l.s4 %v1925_v34  ;;  %v83_v39 = vshrl.u32 %v82_v36, 7  ;;  %s1927_s3 = smov 64   ;;  %s1928_s24 = smov 80  }
  0x2a   :  { %1645 = vmatpush3.bf16.msra.mxu1 %v113_v3  ;;  %v75_v37 = vld [vmem:[#allocation2] sm:$0xf]  ;;  %v1926_v41 = vmov -1e+09   ;;  %vm465_vm5 = vcmask 1043456   ;;  %s1929_s25 = smov 112  }
  0x2b   :  { %1648 = vmatprep.mubr.msk.bf16.mxu1 %vm122_vm0, %v111_v8  ;;  %1646 = vmatprep.subr.bf16.mxu1 %v114_v7  ;;  %v81_v38 = vunpack.c.0.s8 %v80_v35  ;;  %vm76_vm3 = vcmp.gt.s32.totalorder %v75_v37, 0  ;;  %v389_v45 = vsub.s32 0, %v83_v39  ;;  %s1930_s26 = smov 48   ;;  %vm1402_vm6 = vcmask 523264   ;;  %s1931_s20 = smov [#allocation7]  }
  0x2c   :  { %v77_v42 = vsel %vm76_vm3, 0.0, %v1926_v41 }
  0x2d   :  { %v84_v40 = vsub.s32 %v81_v38, %v83_v39 }
  0x2e   :  { %1647 = vmatpush3.bf16.msra.mxu1 %v114_v7 }
  0x2f   :  { %1652 = vmatprep.subr.bf16.mxu1 %v1922_v12  ;;  %v85_v43 = vrot.slane %v77_v42, %v84_v40 }
  0x31   :  { %1649 = vmatmul.mubr.msk.bf16.vlgmr.msra.gmra.mrb[0].mxu1 %vm122_vm0, %v112_v11  ;;  %v93_v44 = vrot.slane %v85_v43, %v84_v40  ;;  %v86_v46 = vcombine.high %v85_v43, %v85_v43 }
  0x32   :  { %1654 = vmatprep.mubr.msk.bf16.mxu1 %vm1923_vm1, %v1922_v12 }
  0x33   :  { %v2124_v47 = vrot.slane %v93_v44, %v389_v45  ;;  %v100_v48 = vrot.slane %v86_v46, %v84_v40  ;;  %v101_v56 = vcombine.high %v93_v44, %v93_v44 }
  0x35   :  { %v2127_v55 = vrot.slane %v100_v48, %v389_v45  ;;  %v2131_v0 = vrot.slane %v101_v56, %v389_v45  ;;  %v102_v1 = vcombine.high %v100_v48, %v100_v48 }
 0x104   :  { %v1650_v14 = vpop.f32.mrb[0].mxu1 }
 0x105   :  { %v172_v15 = vadd.f32 %v1650_v14, %v1558_v13  ;;  %v163_v16 = vpop.f32.mrb[1].mxu1  ;;  %v2135_v14 = vrot.slane %v102_v1, %v389_v45 }
 0x106   :  { %v164_v17 = vadd.f32 %v1558_v13, %v163_v16  ;;  %v1651_v18 = vpop.f32.mrb[2].mxu1 }
 0x107   :  { %v2088_v19 = vpack.c.bf16 %v172_v15, %v172_v15  ;;  %v175_v20 = vadd.f32 %v1651_v18, %v1558_v13  ;;  %v166_v21 = vpop.f32.mrb[3].mxu1 }
 0x108   :  { %v2090_v22 = vpack.c.bf16 %v164_v17, %v164_v17  ;;  %v167_v23 = vadd.f32 %v1558_v13, %v166_v21 }
 0x109   :  { %286 = vrot.lane.b32.xlu1 %v2088_v19, %s1924_s0  ;;  %v2094_v24 = vpack.c.bf16 %v175_v20, %v175_v20 }
 0x10a   :  { %187 = vrot.lane.b32.xlu0 %v2090_v22, %s1924_s0  ;;  %v2096_v25 = vpack.c.bf16 %v167_v23, %v167_v23 }
 0x10d   :  { %335 = vrot.lane.b32.xlu1 %v2094_v24, %s1924_s0 }
 0x10e   :  { %237 = vrot.lane.b32.xlu0 %v2096_v25, %s1924_s0 }
 0x17b   :  { %v287_v28 = vpop.permute.xlu1 %286 }
 0x17c   :  { %v188_v26 = vpop.permute.xlu0 %187  ;;  %v292_v31 = vsel %vm189_vm2, %v287_v28, 0 }
 0x17d   :  { %v194_v27 = vsel %vm189_vm2, %v188_v26, 0 }
 0x17e   :  { %1653 = vmatpush3.bf16.xpose.msra.mxu1 %v194_v27 }
 0x17f   :  { %1664 = vmatprep.subr.bf16.mxu1 %v1922_v12  ;;  %v336_v32 = vpop.permute.xlu1 %335 }
 0x180   :  { %v238_v29 = vpop.permute.xlu0 %237  ;;  %v341_v33 = vsel %vm189_vm2, %v336_v32, 0 }
 0x181   :  { %v243_v30 = vsel %vm189_vm2, %v238_v29, 0 }
 0x182   :  { %1659 = vmatpush3.bf16.xpose.msra.mxu0 %v243_v30 }
 0x183   :  { %1670 = vmatprep.subr.bf16.mxu0 %v1922_v12 }
 0x185   :  { %1655 = vmatmul.mubr.msk.bf16.vlgmr.msra.gmra.mrb[4].mxu1 %vm189_vm2, %v2090_v22 }
 0x186   :  { %1665 = vmatpush3.bf16.xpose.msra.mxu1 %v292_v31  ;;  %1666 = vmatprep.mubr.msk.bf16.mxu1 %vm1923_vm1, %v1922_v12 }
 0x187   :  { %1676 = vmatprep.subr.bf16.mxu1 %v1922_v12 }
 0x189   :  { %1661 = vmatmul.mubr.msk.bf16.vlgmr.msra.gmra.mrb[0].mxu0 %vm189_vm2, %v2096_v25 }
 0x18a   :  { %1671 = vmatpush3.bf16.xpose.msra.mxu0 %v341_v33  ;;  %1672 = vmatprep.mubr.msk.bf16.mxu0 %vm1923_vm1, %v1922_v12 }
 0x18b   :  { %1682 = vmatprep.subr.bf16.mxu0 %v1922_v12 }
 0x18d   :  { %1667 = vmatmul.mubr.msk.bf16.vlgmr.msra.gmra.mrb[8].mxu1 %vm189_vm2, %v2088_v19 }
 0x18e   :  { %1678 = vmatprep.mubr.msk.bf16.mxu1 %vm1923_vm1, %v1922_v12 }
 0x191   :  { %1673 = vmatmul.mubr.msk.bf16.vlgmr.msra.gmra.mrb[4].mxu0 %vm189_vm2, %v2094_v24 }
 0x192   :  { %1684 = vmatprep.mubr.msk.bf16.mxu0 %vm1923_vm1, %v1922_v12 }
 0x258   :  { %v230_v49 = vpop.f32.mrb[4].mxu1 }
 0x259   :  { %v383_v50 = vmul.f32 0.25, %v230_v49  ;;  %v1656_v51 = vpop.f32.mrb[5].mxu1 }
 0x25a   :  { %v233_v52 = vpop.f32.mrb[6].mxu1 }
 0x25b   :  { %v1657_v53 = vpop.f32.mrb[7].mxu1  ;;  %v407_v54 = vadd.f32 %v2124_v47, %v383_v50 }
 0x25c   :  { %v279_v57 = vpop.f32.mrb[0].mxu0 }
 0x25d   :  { %v384_v58 = vmul.f32 0.25, %v279_v57  ;;  %v1662_v59 = vpop.f32.mrb[1].mxu0  ;;  %v412_v60 = vsel %vm411_vm4, %v407_v54, -inf }
 0x25e   :  { %v282_v61 = vpop.f32.mrb[2].mxu0  ;;  %413 = vmax.xlane.f32.xlu0 %v412_v60 }
 0x25f   :  { %v1663_v62 = vpop.f32.mrb[3].mxu0  ;;  %v408_v63 = vadd.f32 %v2127_v55, %v384_v58 }
 0x260   :  { %v328_v2 = vpop.f32.mrb[8].mxu1 }
 0x261   :  { %v385_v3 = vmul.f32 0.25, %v328_v2  ;;  %v1668_v4 = vpop.f32.mrb[9].mxu1  ;;  %v415_v7 = vsel %vm411_vm4, %v408_v63, -inf }
 0x262   :  { %v331_v8 = vpop.f32.mrb[10].mxu1  ;;  %416 = vmax.xlane.f32.xlu1 %v415_v7 }
 0x263   :  { %v1669_v11 = vpop.f32.mrb[11].mxu1  ;;  %v409_v13 = vadd.f32 %v2131_v0, %v385_v3 }
 0x264   :  { %v377_v15 = vpop.f32.mrb[4].mxu0 }
 0x265   :  { %v386_v16 = vmul.f32 0.25, %v377_v15  ;;  %v1674_v17 = vpop.f32.mrb[5].mxu0  ;;  %v418_v18 = vsel %vm411_vm4, %v409_v13, -inf }
 0x266   :  { %v380_v20 = vpop.f32.mrb[6].mxu0  ;;  %419 = vmax.xlane.f32.xlu0 %v418_v18 }
 0x267   :  { %v1675_v21 = vpop.f32.mrb[7].mxu0  ;;  %v410_v23 = vadd.f32 %v2135_v14, %v386_v16 }
 0x269   :  { %v421_v26 = vsel %vm411_vm4, %v410_v23, -inf }
 0x26a   :  { %422 = vmax.xlane.f32.xlu0 %v421_v26 }
 0x273   :  { %460 = vrot.lane.b32.xlu1 %v2090_v22, %s1927_s3 }
 0x2eb   :  { %v414_v27 = vpop.xlane.xlu0 %413 }
 0x2ec   :  { %v424_v28 = vsub.f32 %v407_v54, %v414_v27 }
 0x2ee   :  { %v428_v29 = vmul.f32 1.442695, %v424_v28 }
 0x2ef   :  { %v417_v30 = vpop.xlane.xlu1 %416 }
 0x2f0   :  { %1798 = vpow2.f32 %v428_v29  ;;  %v425_v31 = vsub.f32 %v408_v63, %v417_v30 }
 0x2f2   :  { %v430_v32 = vmul.f32 1.442695, %v425_v31 }
 0x2f3   :  { %v461_v33 = vpop.permute.xlu1 %460  ;;  %v420_v39 = vpop.xlane.xlu0 %419 }
 0x2f4   :  { %1800 = vpow2.f32 %v430_v32  ;;  %v467_v34 = vsel %vm465_vm5, %v461_v33, 0  ;;  %v426_v41 = vsub.f32 %v409_v13, %v420_v39 }
 0x2f5   :  { %1677 = vmatpush3.bf16.msra.mxu1 %v467_v34 }
 0x2f6   :  { %1688 = vmatprep.subr.bf16.mxu1 %v1922_v12  ;;  %v432_v43 = vmul.f32 1.442695, %v426_v41 }
 0x2f7   :  { %v423_v40 = vpop.xlane.xlu0 %422 }
 0x2f8   :  { %v427_v42 = vsub.f32 %v410_v23, %v423_v40  ;;  %1802 = vpow2.f32 %v432_v43 }
 0x2fa   :  { %v1799_v35 = vpop.eup %1798  ;;  %v434_v44 = vmul.f32 1.442695, %v427_v42 }
 0x2fb   :  { %v436_v36 = vsel %vm411_vm4, %v1799_v35, 0.0 }
 0x2fc   :  { %437 = vadd.xlane.f32.xlu1 %v436_v36  ;;  %1804 = vpow2.f32 %v434_v44 }
 0x2fe   :  { %v1801_v37 = vpop.eup %1800 }
 0x2ff   :  { %v439_v38 = vsel %vm411_vm4, %v1801_v37, 0.0 }
 0x300   :  { %440 = vadd.xlane.f32.xlu0 %v439_v38 }
 0x302   :  { %v1803_v45 = vpop.eup %1802 }
 0x303   :  { %v442_v48 = vsel %vm411_vm4, %v1803_v45, 0.0 }
 0x306   :  { %v1805_v46 = vpop.eup %1804 }
 0x307   :  { %v445_v49 = vsel %vm411_vm4, %v1805_v46, 0.0 }
 0x30d   :  { %557 = vrot.lane.b32.xlu1 %v2088_v19, %s1927_s3 }
 0x311   :  { %605 = vrot.lane.b32.xlu1 %v2094_v24, %s1927_s3 }
 0x316   :  { %509 = vrot.lane.b32.xlu0 %v2096_v25, %s1927_s3 }
 0x335   :  { %443 = vadd.xlane.f32.xlu1 %v442_v48  ;;  %446 = vadd.xlane.f32.xlu0 %v445_v49 }
 0x346   :  { %708 = vrot.lane.b32.xlu1 %v2096_v25, %s1928_s24 }
 0x34a   :  { %706 = vrot.lane.b32.xlu1 %v2096_v25, %s1929_s25 }
 0x34b   :  { %658 = vrot.lane.b32.xlu0 %v2090_v22, %s1928_s24 }
 0x34e   :  { %808 = vrot.lane.b32.xlu1 %v2094_v24, %s1928_s24 }
 0x34f   :  { %656 = vrot.lane.b32.xlu0 %v2090_v22, %s1929_s25 }
 0x352   :  { %806 = vrot.lane.b32.xlu1 %v2094_v24, %s1929_s25 }
 0x353   :  { %758 = vrot.lane.b32.xlu0 %v2088_v19, %s1928_s24 }
 0x357   :  { %756 = vrot.lane.b32.xlu0 %v2088_v19, %s1929_s25 }
 0x389   :  { %v438_v50 = vpop.xlane.xlu1 %437 }
 0x38a   :  { %1806 = vrcp.f32 %v438_v50 }
 0x38d   :  { %v441_v51 = vpop.xlane.xlu0 %440  ;;  %v558_v56 = vpop.permute.xlu1 %557 }
 0x38e   :  { %1808 = vrcp.f32 %v441_v51  ;;  %v563_v60 = vsel %vm465_vm5, %v558_v56, 0 }
 0x391   :  { %v510_v52 = vpop.permute.xlu0 %509  ;;  %v606_v62 = vpop.permute.xlu1 %605 }
 0x392   :  { %v515_v53 = vsel %vm465_vm5, %v510_v52, 0  ;;  %v611_v1 = vsel %vm465_vm5, %v606_v62, 0 }
 0x393   :  { %1683 = vmatpush3.bf16.msra.mxu0 %v515_v53 }
 0x394   :  { %v1807_v54 = vpop.eup %1806  ;;  %1694 = vmatprep.subr.bf16.mxu0 %v1922_v12 }
 0x395   :  { %v452_v57 = vmul.f32 %v1807_v54, %v1799_v35 }
 0x397   :  { %v456_v58 = vpack.c.bf16 %v452_v57, %v452_v57 }
 0x398   :  { %v1809_v59 = vpop.eup %1808 }
 0x399   :  { %v453_v61 = vmul.f32 %v1809_v59, %v1801_v37  ;;  %1679 = vmatmul.mubr.msk.bf16.vlgmr.msra.gmra.mrb[12].mxu1 %vm411_vm4, %v456_v58 }
 0x39a   :  { %1689 = vmatpush3.bf16.msra.mxu1 %v563_v60  ;;  %1690 = vmatprep.mubr.msk.bf16.mxu1 %vm1923_vm1, %v1922_v12 }
 0x39b   :  { %v457_v63 = vpack.c.bf16 %v453_v61, %v453_v61  ;;  %1700 = vmatprep.subr.bf16.mxu1 %v1922_v12 }
 0x39d   :  { %1685 = vmatmul.mubr.msk.bf16.vlgmr.msra.gmra.mrb[8].mxu0 %vm411_vm4, %v457_v63 }
 0x39e   :  { %1695 = vmatpush3.bf16.msra.mxu0 %v611_v1  ;;  %1696 = vmatprep.mubr.msk.bf16.mxu0 %vm1923_vm1, %v1922_v12 }
 0x39f   :  { %1706 = vmatprep.subr.bf16.mxu0 %v1922_v12 }
 0x3c2   :  { %v444_v2 = vpop.xlane.xlu1 %443  ;;  %v447_v3 = vpop.xlane.xlu0 %446 }
 0x3c3   :  { %1810 = vrcp.f32 %v444_v2 }
 0x3c4   :  { %1812 = vrcp.f32 %v447_v3 }
 0x3c6   :  { %v659_v4 = vpop.permute.xlu0 %658  ;;  %v709_v7 = vpop.permute.xlu1 %708 }
 0x3c7   :  { %v664_v20 = vsel %vm189_vm2, %v659_v4, 0  ;;  %v714_v23 = vsel %vm189_vm2, %v709_v7, 0 }
 0x3ca   :  { %v657_v17 = vpop.permute.xlu0 %656  ;;  %v707_v21 = vpop.permute.xlu1 %706 }
 0x3cd   :  { %v1811_v8 = vpop.eup %1810 }
 0x3ce   :  { %v1813_v11 = vpop.eup %1812  ;;  %v454_v13 = vmul.f32 %v1811_v8, %v1803_v45  ;;  %v759_v26 = vpop.permute.xlu0 %758 }
 0x3cf   :  { %v455_v15 = vmul.f32 %v1813_v11, %v1805_v46  ;;  %v809_v27 = vpop.permute.xlu1 %808  ;;  %v764_v28 = vsel %vm189_vm2, %v759_v26, 0 }
 0x3d0   :  { %v458_v16 = vpack.c.bf16 %v454_v13, %v454_v13  ;;  %v814_v29 = vsel %vm189_vm2, %v809_v27, 0 }
 0x3d1   :  { %v459_v18 = vpack.c.bf16 %v455_v15, %v455_v15 }
 0x3d2   :  { %1691 = vmatmul.mubr.msk.bf16.vlgmr.msra.gmra.mrb[16].mxu1 %vm411_vm4, %v458_v16  ;;  %v757_v30 = vpop.permute.xlu0 %756 }
 0x3d3   :  { %1697 = vmatmul.mubr.msk.bf16.vlgmr.msra.gmra.mrb[12].mxu0 %vm411_vm4, %v459_v18  ;;  %1701 = vmatpush3.bf16.xpose.msra.mxu1 %v664_v20  ;;  %v807_v31 = vpop.permute.xlu1 %806 }
 0x3d4   :  { %1707 = vmatpush3.bf16.xpose.msra.mxu0 %v714_v23  ;;  %1702 = vmatprep.mubr.msk.bf16.mxu1 %vm1923_vm1, %v1922_v12 }
 0x3d5   :  { %1708 = vmatprep.mubr.msk.bf16.mxu0 %vm1923_vm1, %v1922_v12  ;;  %1712 = vmatprep.subr.bf16.mxu1 %v1922_v12 }
 0x3d6   :  { %1718 = vmatprep.subr.bf16.mxu0 %v1922_v12 }
 0x3da   :  { %1703 = vmatmul.mubr.msk.bf16.vlgmr.msra.gmra.mrb[20].mxu1 %vm189_vm2, %v657_v17 }
 0x3db   :  { %1709 = vmatmul.mubr.msk.bf16.vlgmr.msra.gmra.mrb[16].mxu0 %vm189_vm2, %v707_v21  ;;  %1713 = vmatpush3.bf16.xpose.msra.mxu1 %v764_v28 }
 0x3dc   :  { %1719 = vmatpush3.bf16.xpose.msra.mxu0 %v814_v29  ;;  %1714 = vmatprep.mubr.msk.bf16.mxu1 %vm1923_vm1, %v1922_v12 }
 0x3dd   :  { %1720 = vmatprep.mubr.msk.bf16.mxu0 %vm1923_vm1, %v1922_v12  ;;  %1724 = vmatprep.subr.bf16.mxu1 %v1922_v12 }
 0x3de   :  { %1730 = vmatprep.subr.bf16.mxu0 %v1922_v12 }
 0x3e2   :  { %1715 = vmatmul.mubr.msk.bf16.vlgmr.msra.gmra.mrb[24].mxu1 %vm189_vm2, %v757_v30 }
 0x3e3   :  { %1721 = vmatmul.mubr.msk.bf16.vlgmr.msra.gmra.mrb[20].mxu0 %vm189_vm2, %v807_v31  ;;  %1726 = vmatprep.mubr.msk.bf16.mxu1 %vm1923_vm1, %v1922_v12 }
 0x3e4   :  { %1732 = vmatprep.mubr.msk.bf16.mxu0 %vm1923_vm1, %v1922_v12 }
 0x46c   :  { %v2196_v32 = vpop.f32.mrb[12].mxu1 }
 0x46d   :  { %v1680_v33 = vpop.f32.mrb[13].mxu1 }
 0x46e   :  { %v506_v34 = vpop.f32.mrb[14].mxu1 }
 0x46f   :  { %v1681_v35 = vpop.f32.mrb[15].mxu1 }
 0x470   :  { %v2198_v36 = vpop.f32.mrb[8].mxu0 }
 0x471   :  { %v653_v37 = vpack.c.bf16 %v2198_v36, %v2196_v32  ;;  %v1686_v38 = vpop.f32.mrb[9].mxu0 }
 0x472   :  { %v554_v39 = vpop.f32.mrb[10].mxu0 }
 0x473   :  { %v1687_v40 = vpop.f32.mrb[11].mxu0 }
 0x4a5   :  { %v2202_v41 = vpop.f32.mrb[16].mxu1 }
 0x4a6   :  { %v2204_v42 = vpop.f32.mrb[12].mxu0  ;;  %v1692_v43 = vpop.f32.mrb[17].mxu1 }
 0x4a7   :  { %v654_v44 = vpack.c.bf16 %v2204_v42, %v2202_v41  ;;  %v1698_v45 = vpop.f32.mrb[13].mxu0  ;;  %v602_v46 = vpop.f32.mrb[18].mxu1 }
 0x4a8   :  { %v650_v48 = vpop.f32.mrb[14].mxu0  ;;  %v1693_v49 = vpop.f32.mrb[19].mxu1 }
 0x4a9   :  { %v1699_v50 = vpop.f32.mrb[15].mxu0 }
 0x4ad   :  { %v700_v51 = vpop.f32.mrb[20].mxu1 }
 0x4ae   :  { %v856_v52 = vmul.f32 0.25, %v700_v51  ;;  %v750_v53 = vpop.f32.mrb[16].mxu0  ;;  %v1704_v54 = vpop.f32.mrb[21].mxu1 }
 0x4af   :  { %v857_v56 = vmul.f32 0.25, %v750_v53  ;;  %v1710_v57 = vpop.f32.mrb[17].mxu0  ;;  %v703_v58 = vpop.f32.mrb[22].mxu1 }
 0x4b0   :  { %v753_v59 = vpop.f32.mrb[18].mxu0  ;;  %v1705_v60 = vpop.f32.mrb[23].mxu1  ;;  %v860_v61 = vadd.f32 %v856_v52, %v2124_v47 }
 0x4b1   :  { %v1711_v62 = vpop.f32.mrb[19].mxu0  ;;  %v861_v63 = vadd.f32 %v857_v56, %v2127_v55 }
 0x4b2   :  { %v864_v1 = vsel %vm411_vm4, %v860_v61, -inf }
 0x4b3   :  { %v867_v2 = vsel %vm411_vm4, %v861_v63, -inf  ;;  %865 = vmax.xlane.f32.xlu0 %v864_v1 }
 0x4b4   :  { %868 = vmax.xlane.f32.xlu1 %v867_v2 }
 0x4b5   :  { %v800_v3 = vpop.f32.mrb[24].mxu1 }
 0x4b6   :  { %v858_v4 = vmul.f32 0.25, %v800_v3  ;;  %v850_v7 = vpop.f32.mrb[20].mxu0  ;;  %v1716_v8 = vpop.f32.mrb[25].mxu1 }
 0x4b7   :  { %v859_v11 = vmul.f32 0.25, %v850_v7  ;;  %v1722_v13 = vpop.f32.mrb[21].mxu0  ;;  %v803_v15 = vpop.f32.mrb[26].mxu1 }
 0x4b8   :  { %v853_v16 = vpop.f32.mrb[22].mxu0  ;;  %v1717_v17 = vpop.f32.mrb[27].mxu1  ;;  %v862_v47 = vadd.f32 %v858_v4, %v2131_v0  ;;  %v180_v13 = vld [vmem:[%s2354_s4 + $0x10] sm:$0xff]  ;;  %v181_v15 = vld [vmem:[%s2354_s4 + $0x18] sm:$0xff] }
 0x4b9   :  { %v1723_v18 = vpop.f32.mrb[23].mxu0  ;;  %v863_v20 = vadd.f32 %v859_v11, %v2135_v14  ;;  %v1106_v16 = vpack.c.bf16 %v181_v15, %v180_v13  ;;  %v179_v17 = vld [vmem:[%s2354_s4 + $0x8] sm:$0xff]  ;;  %v1309_v13 = vld [vmem:[#allocation5 + $0x10] sm:$0xff]  ;;  %v1310_v15 = vld [vmem:[#allocation5 + $0x18] sm:$0xff] }
 0x4ba   :  { %v870_v55 = vsel %vm411_vm4, %v862_v47, -inf }
 0x4bb   :  { %871 = vmax.xlane.f32.xlu0 %v870_v55  ;;  %v873_v21 = vsel %vm411_vm4, %v863_v20, -inf }
 0x4bf   :  { %874 = vmax.xlane.f32.xlu0 %v873_v21 }
 0x4c5   :  { %912 = vrot.lane.b32.xlu1 %v2090_v22, %s1930_s26 }
 0x540   :  { %v866_v23 = vpop.xlane.xlu0 %865 }
 0x541   :  { %v869_v26 = vpop.xlane.xlu1 %868  ;;  %v876_v27 = vsub.f32 %v860_v61, %v866_v23 }
 0x542   :  { %v877_v28 = vsub.f32 %v861_v63, %v869_v26 }
 0x543   :  { %v880_v29 = vmul.f32 1.442695, %v876_v27 }
 0x544   :  { %v882_v30 = vmul.f32 1.442695, %v877_v28 }
 0x545   :  { %1814 = vpow2.f32 %v880_v29  ;;  %v913_v0 = vpop.permute.xlu1 %912 }
 0x546   :  { %1816 = vpow2.f32 %v882_v30  ;;  %v918_v31 = vsel %vm465_vm5, %v913_v0, 0 }
 0x547   :  { %1725 = vmatpush3.bf16.msra.mxu1 %v918_v31 }
 0x548   :  { %v872_v14 = vpop.xlane.xlu0 %871  ;;  %1736 = vmatprep.subr.bf16.mxu1 %v1922_v12 }
 0x549   :  { %v878_v33 = vsub.f32 %v862_v47, %v872_v14 }
 0x54b   :  { %v884_v34 = vmul.f32 1.442695, %v878_v33 }
 0x54c   :  { %v875_v35 = vpop.xlane.xlu0 %874 }
 0x54d   :  { %1818 = vpow2.f32 %v884_v34  ;;  %v879_v22 = vsub.f32 %v863_v20, %v875_v35 }
 0x54f   :  { %v1815_v38 = vpop.eup %1814  ;;  %v886_v39 = vmul.f32 1.442695, %v879_v22 }
 0x550   :  { %v1817_v40 = vpop.eup %1816  ;;  %v888_v43 = vsel %vm411_vm4, %v1815_v38, 0.0 }
 0x551   :  { %1820 = vpow2.f32 %v886_v39  ;;  %v891_v45 = vsel %vm411_vm4, %v1817_v40, 0.0  ;;  %889 = vadd.xlane.f32.xlu1 %v888_v43  ;;  %v1581_v39 = vld [vmem:[%s2355_s5] ss:$0 sm:$0xff] }
 0x552   :  { %892 = vadd.xlane.f32.xlu0 %v891_v45 }
 0x557   :  { %v1819_v46 = vpop.eup %1818 }
 0x558   :  { %v894_v48 = vsel %vm411_vm4, %v1819_v46, 0.0 }
 0x559   :  { %895 = vadd.xlane.f32.xlu1 %v894_v48 }
 0x55b   :  { %v1821_v49 = vpop.eup %1820 }
 0x55c   :  { %v897_v50 = vsel %vm411_vm4, %v1821_v49, 0.0 }
 0x55d   :  { %898 = vadd.xlane.f32.xlu0 %v897_v50 }
 0x56a   :  { %1008 = vrot.lane.b32.xlu1 %v2088_v19, %s1930_s26 }
 0x56e   :  { %1056 = vrot.lane.b32.xlu1 %v2094_v24, %s1930_s26 }
 0x573   :  { %960 = vrot.lane.b32.xlu0 %v2096_v25, %s1930_s26 }
 0x5de   :  { %v890_v51 = vpop.xlane.xlu1 %889 }
 0x5df   :  { %1822 = vrcp.f32 %v890_v51  ;;  %v893_v52 = vpop.xlane.xlu0 %892 }
 0x5e0   :  { %1824 = vrcp.f32 %v893_v52 }
 0x5e6   :  { %v896_v53 = vpop.xlane.xlu1 %895 }
 0x5e7   :  { %1826 = vrcp.f32 %v896_v53 }
 0x5e9   :  { %v1823_v54 = vpop.eup %1822 }
 0x5ea   :  { %v1825_v56 = vpop.eup %1824  ;;  %v904_v57 = vmul.f32 %v1823_v54, %v1815_v38  ;;  %v1009_v58 = vpop.permute.xlu1 %1008 }
 0x5eb   :  { %v899_v59 = vpop.xlane.xlu0 %898  ;;  %v905_v19 = vmul.f32 %v1825_v56, %v1817_v40  ;;  %v1014_v61 = vsel %vm465_vm5, %v1009_v58, 0 }
 0x5ec   :  { %1828 = vrcp.f32 %v899_v59  ;;  %v908_v60 = vpack.c.bf16 %v904_v57, %v904_v57 }
 0x5ed   :  { %v909_v1 = vpack.c.bf16 %v905_v19, %v905_v19 }
 0x5ee   :  { %1727 = vmatmul.mubr.msk.bf16.vlgmr.msra.gmra.mrb[28].mxu1 %vm411_vm4, %v908_v60  ;;  %v1057_v62 = vpop.permute.xlu1 %1056 }
 0x5ef   :  { %v961_v24 = vpop.permute.xlu0 %960  ;;  %1737 = vmatpush3.bf16.msra.mxu1 %v1014_v61  ;;  %1738 = vmatprep.mubr.msk.bf16.mxu1 %vm1923_vm1, %v1922_v12  ;;  %v1062_v3 = vsel %vm465_vm5, %v1057_v62, 0 }
 0x5f0   :  { %v966_v25 = vsel %vm465_vm5, %v961_v24, 0  ;;  %1748 = vmatprep.subr.bf16.mxu1 %v1106_v16 }
 0x5f1   :  { %1731 = vmatpush3.bf16.msra.mxu0 %v966_v25  ;;  %v1827_v63 = vpop.eup %1826 }
 0x5f2   :  { %1742 = vmatprep.subr.bf16.mxu0 %v1922_v12  ;;  %v906_v2 = vmul.f32 %v1827_v63, %v1819_v46 }
 0x5f4   :  { %1733 = vmatmul.mubr.msk.bf16.vlgmr.msra.gmra.mrb[24].mxu0 %vm411_vm4, %v909_v1  ;;  %v910_v4 = vpack.c.bf16 %v906_v2, %v906_v2 }
 0x5f5   :  { %1743 = vmatpush3.bf16.msra.mxu0 %v1062_v3  ;;  %1744 = vmatprep.mubr.msk.bf16.mxu0 %vm1923_vm1, %v1922_v12  ;;  %v178_v12 = vld [vmem:[%s2354_s4] sm:$0xff] }
 0x5f6   :  { %v1829_v7 = vpop.eup %1828  ;;  %1739 = vmatmul.mubr.msk.bf16.vlgmr.msra.gmra.mrb[32].mxu1 %vm411_vm4, %v910_v4  ;;  %v655_v47 = vpack.c.bf16 %v179_v17, %v178_v12  ;;  %v1381_v12 = vld [vmem:[%s2360_s10] sm:$0xff]  ;;  %v1382_v17 = vld [vmem:[%s2360_s10 + $0x8] sm:$0xff] }
 0x5f7   :  { %v907_v8 = vmul.f32 %v1829_v7, %v1821_v49  ;;  %1749 = vmatpush3.bf16.msra.mxu1 %v1106_v16  ;;  %v1307_v7 = vld [vmem:[#allocation5] sm:$0xff]  ;;  %v1314_v16 = vpack.c.bf16 %v1310_v15, %v1309_v13 }
 0x5f8   :  { %1754 = vmatprep.subr.bf16.mxu1 %v655_v47 }
 0x5f9   :  { %v911_v11 = vpack.c.bf16 %v907_v8, %v907_v8  ;;  %v1308_v8 = vld [vmem:[#allocation5 + $0x8] sm:$0xff] }
 0x5fc   :  { %1745 = vmatmul.mubr.msk.bf16.vlgmr.msra.gmra.mrb[28].mxu0 %vm411_vm4, %v911_v11  ;;  %v1313_v11 = vpack.c.bf16 %v1308_v8, %v1307_v7  ;;  %v1587_v8 = vld [vmem:[%s2361_s11] ss:$0 sm:$0xff] }
 0x5fe   :  { %1760 = vmatprep.subr.bf16.mxu0 %v1313_v11 }
 0x5ff   :  { %1761 = vmatpush3.bf16.msra.mxu0 %v1313_v11 }
 0x600   :  { %1762 = vmatprep.subr.bf16.mxu0 %v1314_v16 }
 0x603   :  { %1763 = vmatpush3.bf16.msra.mxu0 %v1314_v16 }
 0x6c1   :  { %v954_v18 = vpop.f32.mrb[28].mxu1 }
 0x6c2   :  { %v1728_v55 = vpop.f32.mrb[29].mxu1 }
 0x6c3   :  { %v957_v20 = vpop.f32.mrb[30].mxu1 }
 0x6c4   :  { %v1729_v21 = vpop.f32.mrb[31].mxu1 }
 0x6c7   :  { %v1002_v23 = vpop.f32.mrb[24].mxu0 }
 0x6c8   :  { %v1104_v26 = vpack.c.bf16 %v1002_v23, %v954_v18  ;;  %v1734_v27 = vpop.f32.mrb[25].mxu0 }
 0x6c9   :  { %v1005_v28 = vpop.f32.mrb[26].mxu0  ;;  %v1050_v30 = vpop.f32.mrb[32].mxu1 }
 0x6ca   :  { %v1735_v29 = vpop.f32.mrb[27].mxu0  ;;  %1750 = vmatprep.mubr.msk.bf16.mxu1 %vm189_vm2, %v1104_v26  ;;  %v1740_v0 = vpop.f32.mrb[33].mxu1 }
 0x6cb   :  { %v1053_v31 = vpop.f32.mrb[34].mxu1 }
 0x6cc   :  { %v1741_v14 = vpop.f32.mrb[35].mxu1 }
 0x6cf   :  { %v1098_v33 = vpop.f32.mrb[28].mxu0 }
 0x6d0   :  { %v1105_v34 = vpack.c.bf16 %v1098_v33, %v1050_v30  ;;  %v1746_v35 = vpop.f32.mrb[29].mxu0  ;;  %v1582_v33 = vld [vmem:[%s2356_s6] ss:$0 sm:$0xff] }
 0x6d1   :  { %v1101_v22 = vpop.f32.mrb[30].mxu0 }
 0x6d2   :  { %v1747_v38 = vpop.f32.mrb[31].mxu0  ;;  %1751 = vmatmul.mubr.msk.bf16.vlgmr.msra.gmra.mrb[36].mxu1 %vm189_vm2, %v1105_v34 }
 0x6d3   :  { %1756 = vmatprep.mubr.msk.bf16.mxu1 %vm189_vm2, %v653_v37  ;;  %1755 = vmatpush3.bf16.msra.mxu1 %v655_v47  ;;  %v1391_v47 = vpack.c.bf16 %v1382_v17, %v1381_v12 }
 0x6d5   :  { %1768 = vmatprep.subr.bf16.mxu0 %v1391_v47 }
 0x6de   :  { %1757 = vmatmul.mubr.msk.bf16.vlgmr.msra.gmra.mrb[36].mxu1 %vm189_vm2, %v654_v44 }
 0x7b1   :  { %v1758_v40 = vpop.f32.mrb[36].mxu1 }
 0x7b2   :  { %v1202_v43 = vpop.f32.mrb[37].mxu1  ;;  %v1226_v45 = vadd.f32 %v1758_v40, %v1581_v39  ;;  %v1583_v40 = vld [vmem:[%s2357_s7] ss:$0 sm:$0xff] }
 0x7b3   :  { %v1224_v46 = vadd.f32 %v1581_v39, %v1202_v43  ;;  %v1759_v48 = vpop.f32.mrb[38].mxu1 }
 0x7b4   :  { %v1205_v49 = vpop.f32.mrb[39].mxu1  ;;  %v1227_v36 = vadd.f32 %v1759_v48, %v1581_v39  ;;  %v1230_v42 = vadd.f32 %v1226_v45, %v2069_v9 }
 0x7b5   :  { %v1225_v50 = vadd.f32 %v1581_v39, %v1205_v49  ;;  %v1228_v32 = vadd.f32 %v1224_v46, %v2056_v5 }
 0x7b6   :  { %v1238_v51 = vsel %vm122_vm0, %v1230_v42, 0.0  ;;  %v1231_v52 = vadd.f32 %v1227_v36, %v2074_v10 }
 0x7b7   :  { %v1232_v37 = vsel %vm122_vm0, %v1228_v32, 0.0  ;;  %v1229_v41 = vadd.f32 %v1225_v50, %v2061_v6 }
 0x7b8   :  { %1233 = vadd.xlane.f32.xlu0 %v1232_v37  ;;  %v1241_v53 = vsel %vm122_vm0, %v1231_v52, 0.0 }
 0x7b9   :  { %v1235_v44 = vsel %vm122_vm0, %v1229_v41, 0.0 }
 0x7ba   :  { %1236 = vadd.xlane.f32.xlu1 %v1235_v44 }
 0x7bc   :  { %1239 = vadd.xlane.f32.xlu0 %v1238_v51 }
 0x7c0   :  { %1242 = vadd.xlane.f32.xlu0 %v1241_v53 }
 0x845   :  { %v1234_v5 = vpop.xlane.xlu0 %1233 }
 0x846   :  { %v1245_v54 = vmul.f32 0.03125, %v1234_v5  ;;  %v1385_v5 = vld [vmem:[%s2360_s10 + $0x20] sm:$0xff] }
 0x847   :  { %v1237_v56 = vpop.xlane.xlu1 %1236 }
 0x848   :  { %v1249_v57 = vsub.f32 %v1228_v32, %v1245_v54  ;;  %v1246_v58 = vmul.f32 0.03125, %v1237_v56  ;;  %v1386_v54 = vld [vmem:[%s2360_s10 + $0x28] sm:$0xff] }
 0x849   :  { %v1240_v6 = vpop.xlane.xlu0 %1239  ;;  %v1393_v56 = vpack.c.bf16 %v1386_v54, %v1385_v5 }
 0x84a   :  { %v1250_v59 = vsub.f32 %v1229_v41, %v1246_v58  ;;  %v1247_v9 = vmul.f32 0.03125, %v1240_v6  ;;  %v1253_v60 = vmul.f32 %v1249_v57, %v1249_v57  ;;  %v1383_v41 = vld [vmem:[%s2360_s10 + $0x10] sm:$0xff]  ;;  %v1388_v58 = vld [vmem:[%s2360_s10 + $0x38] sm:$0xff] }
 0x84c   :  { %v1251_v19 = vsub.f32 %v1230_v42, %v1247_v9  ;;  %v1257_v61 = vsel %vm122_vm0, %v1253_v60, 0.0  ;;  %v1254_v24 = vmul.f32 %v1250_v59, %v1250_v59  ;;  %v1384_v42 = vld [vmem:[%s2360_s10 + $0x18] sm:$0xff] }
 0x84d   :  { %v1243_v25 = vpop.xlane.xlu0 %1242  ;;  %1258 = vadd.xlane.f32.xlu1 %v1257_v61  ;;  %v1392_v53 = vpack.c.bf16 %v1384_v42, %v1383_v41 }
 0x84e   :  { %v1248_v10 = vmul.f32 0.03125, %v1243_v25  ;;  %v1260_v62 = vsel %vm122_vm0, %v1254_v24, 0.0  ;;  %v1255_v63 = vmul.f32 %v1251_v19, %v1251_v19 }
 0x84f   :  { %1261 = vadd.xlane.f32.xlu0 %v1260_v62 }
 0x850   :  { %v1252_v1 = vsub.f32 %v1231_v52, %v1248_v10  ;;  %v1263_v2 = vsel %vm122_vm0, %v1255_v63, 0.0 }
 0x851   :  { %1264 = vadd.xlane.f32.xlu1 %v1263_v2 }
 0x852   :  { %v1256_v3 = vmul.f32 %v1252_v1, %v1252_v1 }
 0x854   :  { %v1266_v4 = vsel %vm122_vm0, %v1256_v3, 0.0 }
 0x855   :  { %1267 = vadd.xlane.f32.xlu0 %v1266_v4 }
 0x8da   :  { %v1259_v18 = vpop.xlane.xlu1 %1258 }
 0x8db   :  { %v1269_v55 = vmul.f32 0.03125, %v1259_v18 }
 0x8dc   :  { %v1262_v20 = vpop.xlane.xlu0 %1261 }
 0x8dd   :  { %v1273_v21 = vadd.f32 1e-05, %v1269_v55  ;;  %v1270_v23 = vmul.f32 0.03125, %v1262_v20 }
 0x8de   :  { %v1265_v26 = vpop.xlane.xlu1 %1264 }
 0x8df   :  { %1830 = vrsqrt.f32 %v1273_v21  ;;  %v1274_v27 = vadd.f32 1e-05, %v1270_v23  ;;  %v1271_v28 = vmul.f32 0.03125, %v1265_v26 }
 0x8e1   :  { %1832 = vrsqrt.f32 %v1274_v27  ;;  %v1275_v29 = vadd.f32 1e-05, %v1271_v28 }
 0x8e2   :  { %v1268_v30 = vpop.xlane.xlu0 %1267 }
 0x8e3   :  { %1834 = vrsqrt.f32 %v1275_v29  ;;  %v1272_v0 = vmul.f32 0.03125, %v1268_v30 }
 0x8e5   :  { %v1276_v31 = vadd.f32 1e-05, %v1272_v0 }
 0x8e7   :  { %1836 = vrsqrt.f32 %v1276_v31 }
 0x8e9   :  { %v1831_v14 = vpop.eup %1830 }
 0x8ea   :  { %v1281_v34 = vmul.f32 %v1831_v14, %v1249_v57  ;;  %v1387_v57 = vld [vmem:[%s2360_s10 + $0x30] sm:$0xff] }
 0x8eb   :  { %v1833_v35 = vpop.eup %1832  ;;  %v1394_v6 = vpack.c.bf16 %v1388_v58, %v1387_v57 }
 0x8ec   :  { %v1282_v22 = vmul.f32 %v1833_v35, %v1250_v59  ;;  %v1292_v38 = vmul.f32 %v1582_v33, %v1281_v34  ;;  %v1584_v59 = vld [vmem:[%s2359_s9] ss:$0 sm:$0xff] }
 0x8ed   :  { %v1835_v39 = vpop.eup %1834 }
 0x8ee   :  { %v1283_v43 = vmul.f32 %v1835_v39, %v1251_v19  ;;  %v1293_v45 = vmul.f32 %v1582_v33, %v1282_v22  ;;  %v1303_v46 = vadd.f32 %v1583_v40, %v1292_v38 }
 0x8f0   :  { %v1304_v48 = vadd.f32 %v1583_v40, %v1293_v45  ;;  %v1294_v50 = vmul.f32 %v1582_v33, %v1283_v43 }
 0x8f1   :  { %v1837_v49 = vpop.eup %1836 }
 0x8f2   :  { %v1284_v32 = vmul.f32 %v1837_v49, %v1252_v1  ;;  %v1311_v36 = vpack.c.bf16 %v1304_v48, %v1303_v46  ;;  %v1305_v44 = vadd.f32 %v1583_v40, %v1294_v50 }
 0x8f4   :  { %v1295_v37 = vmul.f32 %v1582_v33, %v1284_v32  ;;  %1764 = vmatprep.mubr.msk.bf16.mxu0 %vm122_vm0, %v1311_v36 }
 0x8f6   :  { %v1306_v51 = vadd.f32 %v1583_v40, %v1295_v37 }
 0x8f8   :  { %v1312_v52 = vpack.c.bf16 %v1306_v51, %v1305_v44 }
 0x8fa   :  { %1765 = vmatmul.mubr.msk.bf16.vlgmr.msra.gmra.mrb[32].mxu0 %vm122_vm0, %v1312_v52 }
 0x8fb   :  { %1769 = vmatpush3.bf16.msra.mxu0 %v1391_v47 }
 0x8fc   :  { %1770 = vmatprep.subr.bf16.mxu0 %v1392_v53 }
 0x8ff   :  { %1771 = vmatpush3.bf16.msra.mxu0 %v1392_v53 }
 0x900   :  { %1772 = vmatprep.subr.bf16.mxu0 %v1393_v56 }
 0x903   :  { %1773 = vmatpush3.bf16.msra.mxu0 %v1393_v56 }
 0x904   :  { %1774 = vmatprep.subr.bf16.mxu0 %v1394_v6 }
 0x907   :  { %1775 = vmatpush3.bf16.msra.mxu0 %v1394_v6 }
 0x9cd   :  { %v1766_v9 = vpop.f32.mrb[32].mxu0 }
 0x9ce   :  { %v1371_v60 = vadd.f32 %v1766_v9, %v1584_v59  ;;  %v1362_v19 = vpop.f32.mrb[33].mxu0  ;;  %v1590_v9 = vld [vmem:[%s2362_s12] ss:$0 sm:$0xff]  ;;  %s1545_s12 = sshll.u32 %s1931_s20, 4  ;;  %s1546_s12 = int_to_ptr.vmem [resolvable:$true] %s1545_s12 }
 0x9cf   :  { %v1363_v61 = vadd.f32 %v1584_v59, %v1362_v19  ;;  %v1767_v24 = vpop.f32.mrb[34].mxu0  ;;  %p1895_p3 = scmp.lt.s32.totalorder %s1546_s12, %s1546_s12 }
 0x9d0   :  { %v1374_v25 = vadd.f32 %v1767_v24, %v1584_v59  ;;  %v1365_v10 = vpop.f32.mrb[35].mxu0  ;;  %v1379_v63 = vmax.f32 %v1371_v60, 0.0 }
 0x9d1   :  { %v1366_v62 = vadd.f32 %v1584_v59, %v1365_v10  ;;  %v1377_v2 = vmax.f32 %v1363_v61, 0.0  ;;  %v1591_v61 = vld [vmem:[%s2363_s13] ss:$0 sm:$0xff]  ;;  %s1890_s13 = scalar_lea.vmem %s1546_s12, 512 }
 0x9d2   :  { %v1380_v1 = vmax.f32 %v1374_v25, 0.0  ;;  %p1891_p2 = scmp.ne.s32.totalorder %s1546_s12, %s1890_s13  ;;  %p1896_p4 = scmp.lt.s32.totalorder %s1890_s13, %s1890_s13 }
 0x9d3   :  { %v1378_v3 = vmax.f32 %v1366_v62, 0.0 }
 0x9d4   :  { %v1390_v4 = vpack.c.bf16 %v1380_v1, %v1379_v63  ;;  %p1897_p5 = por %p1896_p4, %p1895_p3 }
 0x9d5   :  { %v1389_v7 = vpack.c.bf16 %v1378_v3, %v1377_v2 }
 0x9d6   :  { %p1898_p6 = pnand %p1897_p5, %p1891_p2 }
 0x9d7   :  { %1776 = vmatprep.mubr.msk.bf16.mxu0 %vm1402_vm6, %v1389_v7 }
 0x9d8   :  { %1777 = vmatmul.mubr.msk.bf16.vlgmr.msra.gmra.mrb[36].mxu0 %vm1402_vm6, %v1390_v4 }
 0xaab   :  { %v1778_v11 = vpop.f32.mrb[36].mxu0 }
 0xaac   :  { %v1443_v13 = vpop.f32.mrb[37].mxu0  ;;  %v1452_v15 = vadd.f32 %v1778_v11, %v1587_v8 }
 0xaad   :  { %v1444_v16 = vadd.f32 %v1587_v8, %v1443_v13  ;;  %v1779_v12 = vpop.f32.mrb[38].mxu0 }
 0xaae   :  { %v1446_v17 = vpop.f32.mrb[39].mxu0  ;;  %v1455_v47 = vadd.f32 %v1779_v12, %v1587_v8  ;;  %v1460_v23 = vadd.f32 %v1452_v15, %v1305_v44 }
 0xaaf   :  { %v1447_v18 = vadd.f32 %v1587_v8, %v1446_v17  ;;  %v1458_v55 = vadd.f32 %v1444_v16, %v1303_v46 }
 0xab0   :  { %v1461_v27 = vadd.f32 %v1455_v47, %v1306_v51  ;;  %v1468_v28 = vsel %vm122_vm0, %v1460_v23, 0.0 }
 0xab1   :  { %v1462_v20 = vsel %vm122_vm0, %v1458_v55, 0.0  ;;  %v1459_v21 = vadd.f32 %v1447_v18, %v1304_v48 }
 0xab2   :  { %1463 = vadd.xlane.f32.xlu1 %v1462_v20  ;;  %v1471_v29 = vsel %vm122_vm0, %v1461_v27, 0.0 }
 0xab3   :  { %v1465_v26 = vsel %vm122_vm0, %v1459_v21, 0.0 }
 0xab4   :  { %1466 = vadd.xlane.f32.xlu0 %v1465_v26 }
 0xab6   :  { %1469 = vadd.xlane.f32.xlu1 %v1468_v28 }
 0xab8   :  { %1472 = vadd.xlane.f32.xlu0 %v1471_v29 }
 0xb3f   :  { %v1464_v30 = vpop.xlane.xlu1 %1463 }
 0xb40   :  { %v1474_v0 = vmul.f32 0.03125, %v1464_v30 }
 0xb41   :  { %v1467_v31 = vpop.xlane.xlu0 %1466 }
 0xb42   :  { %v1478_v14 = vsub.f32 %v1458_v55, %v1474_v0  ;;  %v1475_v33 = vmul.f32 0.03125, %v1467_v31 }
 0xb43   :  { %v1470_v34 = vpop.xlane.xlu1 %1469 }
 0xb44   :  { %v1479_v35 = vsub.f32 %v1459_v21, %v1475_v33  ;;  %v1476_v22 = vmul.f32 0.03125, %v1470_v34  ;;  %v1482_v38 = vmul.f32 %v1478_v14, %v1478_v14 }
 0xb45   :  { %v1473_v39 = vpop.xlane.xlu0 %1472 }
 0xb46   :  { %v1480_v40 = vsub.f32 %v1460_v23, %v1476_v22  ;;  %v1477_v43 = vmul.f32 0.03125, %v1473_v39  ;;  %v1486_v45 = vsel %vm122_vm0, %v1482_v38, 0.0  ;;  %v1483_v46 = vmul.f32 %v1479_v35, %v1479_v35 }
 0xb47   :  { %1487 = vadd.xlane.f32.xlu1 %v1486_v45 }
 0xb48   :  { %v1481_v48 = vsub.f32 %v1461_v27, %v1477_v43  ;;  %v1489_v49 = vsel %vm122_vm0, %v1483_v46, 0.0  ;;  %v1484_v50 = vmul.f32 %v1480_v40, %v1480_v40 }
 0xb49   :  { %1490 = vadd.xlane.f32.xlu0 %v1489_v49 }
 0xb4a   :  { %v1492_v32 = vsel %vm122_vm0, %v1484_v50, 0.0  ;;  %v1485_v36 = vmul.f32 %v1481_v48, %v1481_v48 }
 0xb4b   :  { %1493 = vadd.xlane.f32.xlu1 %v1492_v32 }
 0xb4c   :  { %v1495_v37 = vsel %vm122_vm0, %v1485_v36, 0.0 }
 0xb4d   :  { %1496 = vadd.xlane.f32.xlu0 %v1495_v37 }
 0xbd4   :  { %v1488_v41 = vpop.xlane.xlu1 %1487 }
 0xbd5   :  { %v1498_v42 = vmul.f32 0.03125, %v1488_v41 }
 0xbd6   :  { %v1491_v44 = vpop.xlane.xlu0 %1490 }
 0xbd7   :  { %v1502_v51 = vadd.f32 1e-05, %v1498_v42  ;;  %v1499_v52 = vmul.f32 0.03125, %v1491_v44 }
 0xbd8   :  { %v1494_v53 = vpop.xlane.xlu1 %1493 }
 0xbd9   :  { %1838 = vrsqrt.f32 %v1502_v51  ;;  %v1503_v5 = vadd.f32 1e-05, %v1499_v52  ;;  %v1500_v54 = vmul.f32 0.03125, %v1494_v53 }
 0xbda   :  { %v1497_v56 = vpop.xlane.xlu0 %1496 }
 0xbdb   :  { %1840 = vrsqrt.f32 %v1503_v5  ;;  %v1504_v57 = vadd.f32 1e-05, %v1500_v54  ;;  %v1501_v58 = vmul.f32 0.03125, %v1497_v56 }
 0xbdd   :  { %1842 = vrsqrt.f32 %v1504_v57  ;;  %v1505_v6 = vadd.f32 1e-05, %v1501_v58 }
 0xbdf   :  { %1844 = vrsqrt.f32 %v1505_v6 }
 0xbe3   :  { %v1839_v59 = vpop.eup %1838 }
 0xbe4   :  { %v1510_v60 = vmul.f32 %v1839_v59, %v1478_v14 }
 0xbe5   :  { %v1841_v19 = vpop.eup %1840 }
 0xbe6   :  { %v1521_v24 = vmul.f32 %v1590_v9, %v1510_v60  ;;  %v1511_v25 = vmul.f32 %v1841_v19, %v1479_v35 }
 0xbe7   :  { %v1843_v10 = vpop.eup %1842 }
 0xbe8   :  { %v1522_v62 = vmul.f32 %v1590_v9, %v1511_v25  ;;  %v1512_v63 = vmul.f32 %v1843_v10, %v1480_v40  ;;  %v1532_v1 = vadd.f32 %v1591_v61, %v1521_v24 }
 0xbe9   :  { %v1845_v2 = vpop.eup %1844 }
 0xbea   :  { %v1523_v3 = vmul.f32 %v1590_v9, %v1512_v63  ;;  %v1513_v4 = vmul.f32 %v1845_v2, %v1481_v48  ;;  %v1533_v7 = vadd.f32 %v1591_v61, %v1522_v62  ;;  %1536 = vst.msk [vmem:[#allocation7] sm:$0xff] %vm122_vm0, %v1532_v1 }
 0xbec   :  { %v1524_v8 = vmul.f32 %v1590_v9, %v1513_v4  ;;  %v1534_v11 = vadd.f32 %v1591_v61, %v1523_v3  ;;  %1537 = vst.msk [vmem:[#allocation7 + $0x8] sm:$0xff] %vm122_vm0, %v1533_v7 }
 0xbee   :  { %v1535_v13 = vadd.f32 %v1591_v61, %v1524_v8  ;;  %1538 = vst.msk [vmem:[#allocation7 + $0x10] sm:$0xff] %vm122_vm0, %v1534_v11 }
 0xbf0   :  { %1539 = vst.msk [vmem:[#allocation7 + $0x18] sm:$0xff] %vm122_vm0, %v1535_v13 }
 0xbf1   :  { %1901 = shalt.err (!%p1898_p6)
}
 0xbf2   :  { %s1902_s23 = scalar_lea.hbm %s2364_s14, 512 }
 0xbf3   :  { %p1903_p7 = scmp.ne.s32.totalorder %s2364_s14, %s1902_s23  ;;  %p1906_p8 = scmp.lt.u32.totalorder %s1902_s23, %s2364_s14 }
 0xbf5   :  { %p1908_p9 = pnand %p1906_p8, %p1903_p7 }
 0xbf7   :  { %1911 = shalt.err (!%p1908_p9)
}
 0xbf8   :  { %1551 = dma.vmem_to_hbm [thread:$0]  %s1546_s12, 512, %s2364_s14, [#allocation4], %s1920_s1, %s1920_s1, %s1921_s30  }
 0xbf9   :  { %1916 = dma.done.wait [#allocation4], 512  }
 0xbfa   :  { %1917 = vsyncadd [#allocation4], 4294966784 }
 0xbfb   :  { %1555 = vsyncpa [#allocation3], 1 }
 0xbfc   :  { %1556 = vsyncpa [#allocation6], 1 }
 0xbfd   :  { %1557 = vsyncpa [#allocation4], 1 }

</bundles_post_ra>
